<compile_context>
chip_gen: v5e
topology: v5e:2x2
jax: 0.10.0
libtpu: 0.0.40
codegen_flags: <defaults>
</compile_context>

<pallas_src>
import functools

import jax
import jax.numpy as jnp
from jax.experimental import pallas as pl
from jax.experimental.pallas import tpu as pltpu


# ---------------------------------------------------------------------------
# Small helpers
# ---------------------------------------------------------------------------

def _round_up(n, k):
    return (n + k - 1) // k * k


def _cdiv(a, b):
    return -(-a // b)


# ---------------------------------------------------------------------------
# Kernels
# ---------------------------------------------------------------------------

def _silu(h):
    # silu(h) = h * sigmoid(h) = h / (1 + exp(-h)).
    # exp + approx reciprocal both run on the EUP slot, keeping the VPU free
    # under the MXU matmuls.
    return h * pl.reciprocal(1.0 + jnp.exp(-h), approx=True)


def _ffn_kernel_acc(x_ref, w1_ref, w3_ref, w2_ref, o_ref, acc_ref):
    """Grid = (m, f).  Used when the output dtype is not f32 (f32 scratch acc).

    x_ref  : (tile_m, D)   token tile (compute dtype), resident across f
    w1_ref : (D, tile_f)   gate-projection chunk
    w3_ref : (D, tile_f)   up-projection chunk
    w2_ref : (tile_f, D)   down-projection chunk
    o_ref  : (tile_m, D)   output tile (resident across the f axis)
    acc_ref: (tile_m, D)   f32 accumulator scratch
    """
    f = pl.program_id(1)

    @pl.when(f == 0)
    def _():
        acc_ref[...] = jnp.zeros_like(acc_ref)

    x = x_ref[...]
    h1 = jnp.dot(x, w1_ref[...], preferred_element_type=jnp.float32)
    h3 = jnp.dot(x, w3_ref[...], preferred_element_type=jnp.float32)
    g = _silu(h1) * h3
    acc_ref[...] += jnp.dot(g.astype(w2_ref.dtype), w2_ref[...],
                            preferred_element_type=jnp.float32)

    @pl.when(f == pl.num_programs(1) - 1)
    def _():
        o_ref[...] = acc_ref[...].astype(o_ref.dtype)


def _ffn_kernel_f32_out(x_ref, w1_ref, w3_ref, w2_ref, o_ref):
    """Same as above, but accumulates directly into the resident f32 output."""
    f = pl.program_id(1)

    @pl.when(f == 0)
    def _():
        o_ref[...] = jnp.zeros_like(o_ref)

    x = x_ref[...]
    h1 = jnp.dot(x, w1_ref[...], preferred_element_type=jnp.float32)
    h3 = jnp.dot(x, w3_ref[...], preferred_element_type=jnp.float32)
    g = _silu(h1) * h3
    o_ref[...] += jnp.dot(g.astype(w2_ref.dtype), w2_ref[...],
                          preferred_element_type=jnp.float32)


# ---------------------------------------------------------------------------
# Hardware detection / tile selection (D-, M- and VMEM-aware)
# ---------------------------------------------------------------------------

@functools.lru_cache(maxsize=1)
def _tpu_defaults():
    """Returns (generation tag, vmem_capacity_bytes, vmem_limit_bytes)."""
    try:
        cap = pltpu.get_tpu_info().vmem_capacity_bytes
    except Exception:
        cap = 128 << 20
    kind = ""
    try:
        kind = jax.devices()[0].device_kind.lower()
    except Exception:
        pass
    if ("v5 lite" in kind) or ("v5e" in kind) or ("v5litepod" in kind):
        gen = "v5e"
    elif ("v7" in kind) or (cap <= (64 << 20)):
        gen = "v7x"          # 64 MiB VMEM per TensorCore class
    else:
        gen = "v6e"          # also v5p / unknown 128 MiB-class chips
    # v7x: keep scoped limit at 3/4 of 64 MiB; v5e/v6e: push toward 7/8 of 128 MiB.
    frac = 0.75 if gen == "v7x" else 0.875
    return gen, cap, int(cap * frac)


def _tile_f_candidates(F):
    """Divisors of F that are multiples of 128 (plus F itself), descending."""
    cands = [t for t in range(128, F, 128) if F % t == 0]
    cands.append(F)  # full-extent block is always layout-legal
    return sorted(set(cands), reverse=True)


def _vmem_bytes(tile_m, tile_f, D, w_item, x_item, out_item, needs_acc):
    """Conservative VMEM footprint estimate for one grid step."""
    wb = 2 * 3 * D * tile_f * w_item           # double-buffered w1, w3, w2 blocks
    xb = 2 * tile_m * D * x_item               # double-buffered x block
    ob = 2 * tile_m * D * out_item             # output block (+ writeback buffer)
    ab = tile_m * D * 4 if needs_acc else 0    # f32 accumulator scratch
    tb = tile_m * tile_f * (3 * 4 + w_item)    # h1/h3/g f32 temporaries + g cast
    return wb + xb + ob + ab + tb


def _select_tiles(M, D, F, gen, budget, w_item, x_item, out_item, needs_acc,
                  tile_m=None, tile_f=None):
    """Pick (tile_m, tile_f) from M, D, F, dtype sizes and the VMEM budget."""
    decode = M <= 256

    cands = _tile_f_candidates(F)
    if tile_f is not None:
        assert F % tile_f == 0 and (tile_f % 128 == 0 or tile_f == F), \
            "tile_f must divide F and be a multiple of 128 (or equal F)"
        f_cands = [tile_f]
    else:
        # decode: amortize per-grid-step overhead with larger F chunks;
        # prefill: weight blocks are re-streamed per M tile, keep them moderate.
        cap_f = (512 if gen == "v7x" else 2048) if decode else 512
        f_cands = [c for c in cands if c <= cap_f] or [min(cands)]

    if tile_m is not None:
        tm_list = [_round_up(tile_m, 8)]
    elif decode:
        tm_list = [_round_up(max(M, 1), 8)]      # whole (small) M in one tile
    else:
        # prefill: big tile_m = arithmetic-intensity knob (fewer weight passes).
        tm_target = 512 if gen == "v7x" else 1024
        n_m = max(1, _cdiv(M, tm_target))
        if gen == "v7x":
            n_m = max(n_m, 2)    # >= 2 M tiles so both TensorCores get work
        tm_list = []
        while True:
            tm = _round_up(_cdiv(M, n_m), 8)
            if not tm_list or tm < tm_list[-1]:
                tm_list.append(tm)
            if tm <= 256:
                break
            n_m *= 2

    for tm in tm_list:                     # largest tile_m first
        for tf in f_cands:                 # largest tile_f first
            if _vmem_bytes(tm, tf, D, w_item, x_item, out_item,
                           needs_acc) <= budget:
                return tm, tf
    # Nothing fit the (conservative) estimate: use the smallest combination.
    return tm_list[-1], f_cands[-1]


# ---------------------------------------------------------------------------
# One-time weight preparation (do this at model load, NOT per forward call)
# ---------------------------------------------------------------------------

def prepare_ffn_weights(w1w3, w2, *, intermediate_size, dtype=jnp.bfloat16):
    """Transpose/cast the PyTorch-layout FFN weights once.

    Args:
      w1w3: [2F, D] fused nn.Linear weight (out_features, in_features)
      w2  : [D, F]  nn.Linear weight (out_features, in_features)
      dtype: MXU storage/compute dtype (bf16 recommended for inference).

    Returns (w1_t [D, F], w3_t [D, F], w2_t [F, D]).
    """
    F = intermediate_size
    D = w1w3.shape[1]
    assert w1w3.shape == (2 * F, D), "expected torch layout [2F, D]"
    assert w2.shape == (D, F), "expected torch layout [D, F]"
    w1_t = jnp.asarray(w1w3[:F, :]).T.astype(dtype)
    w3_t = jnp.asarray(w1w3[F:, :]).T.astype(dtype)
    w2_t = jnp.asarray(w2).T.astype(dtype)
    return w1_t, w3_t, w2_t


# ---------------------------------------------------------------------------
# Forward
# ---------------------------------------------------------------------------

def feed_forward_pallas(x, w1_t, w3_t, w2_t, *, tile_m=None, tile_f=None):
    """x: [..., D]; weights from prepare_ffn_weights()."""
    orig_shape = x.shape
    orig_dtype = x.dtype
    D = orig_shape[-1]
    F = w1_t.shape[1]
    assert w1_t.shape == (D, F) and w3_t.shape == (D, F) and w2_t.shape == (F, D)
    assert D % 128 == 0, "model dim must be a multiple of 128"

    M = 1
    for s in orig_shape[:-1]:
        M *= s
    M = max(M, 1)

    gen, _, vmem_limit = _tpu_defaults()
    budget = int(vmem_limit * 0.85)   # headroom for compiler-internal scratch

    compute_dtype = w1_t.dtype
    w_item = jnp.dtype(compute_dtype).itemsize
    out_item = jnp.dtype(orig_dtype).itemsize
    out_is_f32 = orig_dtype == jnp.float32

    tile_m, tile_f = _select_tiles(
        M, D, F, gen, budget, w_item, w_item, out_item,
        needs_acc=not out_is_f32, tile_m=tile_m, tile_f=tile_f)

    M_pad = _round_up(M, tile_m)
    x2d = x.reshape(M, D).astype(compute_dtype)
    if M_pad != M:
        x2d = jnp.pad(x2d, ((0, M_pad - M), (0, 0)))

    grid_m = M_pad // tile_m
    grid = (grid_m, F // tile_f)

    in_specs = [
        pl.BlockSpec((tile_m, D), lambda m, f: (m, 0)),   # x tile (resident over f)
        pl.BlockSpec((D, tile_f), lambda m, f: (0, f)),   # w1 chunk
        pl.BlockSpec((D, tile_f), lambda m, f: (0, f)),   # w3 chunk
        pl.BlockSpec((tile_f, D), lambda m, f: (f, 0)),   # w2 chunk
    ]
    out_spec = pl.BlockSpec((tile_m, D), lambda m, f: (m, 0))

    if out_is_f32:
        kernel = _ffn_kernel_f32_out
        scratch_shapes = []
    else:
        kernel = _ffn_kernel_acc
        scratch_shapes = [pltpu.VMEM((tile_m, D), jnp.float32)]

    # Weights are re-streamed once per M tile; x read / output written once.
    weight_bytes = 3 * D * F * w_item
    cost = pl.CostEstimate(
        flops=int(6 * M_pad * D * F),
        transcendentals=int(M_pad * F),
        bytes_accessed=int(grid_m * weight_bytes
                           + M_pad * D * w_item
                           + M_pad * D * out_item),
    )

    # TODO(synk): for v7x decode (single M tile), a variant that splits the F
    # reduction across the two TensorCores (partial (M, D) sums combined via
    # CMEM or outside) would recover the idle second core.

    out = pl.pallas_call(
        kernel,
        out_shape=jax.ShapeDtypeStruct((M_pad, D), orig_dtype),
        grid_spec=pltpu.PrefetchScalarGridSpec(
            num_scalar_prefetch=0,
            grid=grid,
            in_specs=in_specs,
            out_specs=out_spec,
            scratch_shapes=scratch_shapes,
        ),
        compiler_params=pltpu.CompilerParams(
            dimension_semantics=("parallel", "arbitrary"),
            vmem_limit_bytes=int(vmem_limit),
        ),
        cost_estimate=cost,
    )(x2d, w1_t, w3_t, w2_t)

    if M_pad != M:
        out = out[:M]
    return out.reshape(orig_shape)


# ---------------------------------------------------------------------------
# Pure-JAX reference mirroring the PyTorch forward
# ---------------------------------------------------------------------------

def feed_forward_ref(x, w1w3, w2, *, intermediate_size):
    F = intermediate_size
    h = x @ w1w3.T
    w1_out, w3_out = h[..., :F], h[..., F:]
    return (jax.nn.silu(w1_out) * w3_out) @ w2.T


if __name__ == "__main__":
    # Small, tile-friendly config (synthetic ModelArgs):
    #   dim = 256, intermediate_size = 512, batch = 2, seq = 8
    dim = 256
    intermediate_size = 512
    batch, seq = 2, 8

    key = jax.random.PRNGKey(0)
    k_x, k_w13, k_w2, k_pre = jax.random.split(key, 4)

    x = jax.random.normal(k_x, (batch, seq, dim), dtype=jnp.float32)
    # nn.Linear weights: [out_features, in_features], bias=False
    w1w3 = jax.random.normal(
        k_w13, (2 * intermediate_size, dim), dtype=jnp.float32) * 0.02
    w2 = jax.random.normal(
        k_w2, (dim, intermediate_size), dtype=jnp.float32) * 0.02

    y_ref = feed_forward_ref(x, w1w3, w2, intermediate_size=intermediate_size)

    # --- f32-weight path, decode-regime tiling (M = 16) ----------------------
    # Tolerance accounts for the approx-reciprocal silu (EUP path).
    w1_f, w3_f, w2_f = prepare_ffn_weights(
        w1w3, w2, intermediate_size=intermediate_size, dtype=jnp.float32)
    y = jax.block_until_ready(feed_forward_pallas(x, w1_f, w3_f, w2_f))
    assert y.shape == (batch, seq, dim)
    assert jnp.allclose(y, y_ref, atol=5e-3, rtol=1e-2), "f32 path mismatch"

    # --- bf16-weight path (inference config): looser tolerance ---------------
    w1_b, w3_b, w2_b = prepare_ffn_weights(
        w1w3, w2, intermediate_size=intermediate_size, dtype=jnp.bfloat16)
    y_bf = jax.block_until_ready(feed_forward_pallas(x, w1_b, w3_b, w2_b))
    assert jnp.allclose(y_bf, y_ref, atol=2e-2, rtol=2e-2), "bf16 path mismatch"

    # --- odd token count exercises the M-padding path -------------------------
    x_odd = x[:, :5, :]                         # M = 10 -> padded to tile multiple
    y_odd = jax.block_until_ready(feed_forward_pallas(x_odd, w1_f, w3_f, w2_f))
    y_odd_ref = feed_forward_ref(x_odd, w1w3, w2,
                                 intermediate_size=intermediate_size)
    assert jnp.allclose(y_odd, y_odd_ref, atol=5e-3, rtol=1e-2), \
        "padded-M path mismatch"

    # --- prefill-sized M (> 256) exercises derived tile_m / multi-tile M axis -
    x_pre = jax.random.normal(k_pre, (1, 320, dim), dtype=jnp.float32)
    y_pre = jax.block_until_ready(feed_forward_pallas(x_pre, w1_f, w3_f, w2_f))
    y_pre_ref = feed_forward_ref(x_pre, w1w3, w2,
                                 intermediate_size=intermediate_size)
    assert jnp.allclose(y_pre, y_pre_ref, atol=5e-3, rtol=1e-2), \
        "prefill path mismatch"

    # --- bf16 activations + bf16 weights -> exercises the f32-scratch kernel --
    x_bf = x.astype(jnp.bfloat16)
    y_abf = jax.block_until_ready(feed_forward_pallas(x_bf, w1_b, w3_b, w2_b))
    assert y_abf.dtype == jnp.bfloat16
    assert jnp.allclose(y_abf.astype(jnp.float32), y_ref,
                        atol=3e-2, rtol=3e-2), "bf16-activation path mismatch"

    print("KERNEL_OK")
</pallas_src>

<mosaic_0001>
module attributes {stable_mosaic.version = 11 : i64} {
  func.func @_ffn_kernel_f32_out(%arg0: i32, %arg1: i32, %arg2: memref<16x256xf32, #tpu.memory_space<vmem>>, %arg3: memref<256x512xf32, #tpu.memory_space<vmem>>, %arg4: memref<256x512xf32, #tpu.memory_space<vmem>>, %arg5: memref<512x256xf32, #tpu.memory_space<vmem>>, %arg6: memref<16x256xf32, #tpu.memory_space<vmem>>) attributes {dimension_semantics = [#tpu.dimension_semantics<parallel>, #tpu.dimension_semantics<arbitrary>], iteration_bounds = array<i64: 1, 1>, scalar_prefetch = 0 : i64, scratch_operands = 0 : i64, tpu.core_type = #tpu.core_type<tc>, window_params = [{transform_indices = @transform_0, window_bounds = array<i64: 16, 256>}, {transform_indices = @transform_1, window_bounds = array<i64: 256, 512>}, {transform_indices = @transform_2, window_bounds = array<i64: 256, 512>}, {transform_indices = @transform_3, window_bounds = array<i64: 512, 256>}, {transform_indices = @transform_4, window_bounds = array<i64: 16, 256>}]} {
    %c0_i32 = arith.constant 0 : i32
    %0 = arith.cmpi eq, %arg1, %c0_i32 : i32
    %1 = arith.extui %0 : i1 to i32
    %c0_i32_0 = arith.constant 0 : i32
    %2 = arith.cmpi ne, %1, %c0_i32_0 : i32
    scf.if %2 {
      %cst_16 = arith.constant 0.000000e+00 : f32
      %21 = vector.broadcast %cst_16 : f32 to vector<16x256xf32>
      %c0_17 = arith.constant 0 : index
      %c0_18 = arith.constant 0 : index
      %22 = vector.load %arg6[%c0_17, %c0_18] : memref<16x256xf32, #tpu.memory_space<vmem>>, vector<16x256xf32>
      tpu.vector_store %arg6[%c0_17, %c0_18], %21 {strides = array<i32>} : memref<16x256xf32, #tpu.memory_space<vmem>>, vector<16x256xf32>,
    } else {
    }
    %c0 = arith.constant 0 : index
    %c0_1 = arith.constant 0 : index
    %3 = vector.load %arg2[%c0, %c0_1] : memref<16x256xf32, #tpu.memory_space<vmem>>, vector<16x256xf32>
    %c0_2 = arith.constant 0 : index
    %c0_3 = arith.constant 0 : index
    %4 = vector.load %arg3[%c0_2, %c0_3] : memref<256x512xf32, #tpu.memory_space<vmem>>, vector<256x512xf32>
    %cst = arith.constant dense<0.000000e+00> : vector<16x512xf32>
    %5 = tpu.matmul %3, %4, %cst {dimension_numbers = #tpu.dot_dimension_numbers<[1], [0], [0], [1], [0, 0, 1, 1], [], []>} : vector<16x256xf32>, vector<256x512xf32>, vector<16x512xf32> -> vector<16x512xf32>
    %c0_4 = arith.constant 0 : index
    %c0_5 = arith.constant 0 : index
    %6 = vector.load %arg4[%c0_4, %c0_5] : memref<256x512xf32, #tpu.memory_space<vmem>>, vector<256x512xf32>
    %cst_6 = arith.constant dense<0.000000e+00> : vector<16x512xf32>
    %7 = tpu.matmul %3, %6, %cst_6 {dimension_numbers = #tpu.dot_dimension_numbers<[1], [0], [0], [1], [0, 0, 1, 1], [], []>} : vector<16x256xf32>, vector<256x512xf32>, vector<16x512xf32> -> vector<16x512xf32>
    %cst_7 = arith.constant 0.000000e+00 : f32
    %8 = vector.broadcast %cst_7 : f32 to vector<16x512xf32>
    %9 = arith.subf %8, %5 : vector<16x512xf32>
    %10 = math.exp %9 : vector<16x512xf32>
    %cst_8 = arith.constant 1.000000e+00 : f32
    %11 = vector.broadcast %cst_8 : f32 to vector<16x512xf32>
    %12 = arith.addf %11, %10 : vector<16x512xf32>
    %13 = tpu.reciprocal %12 {approx = true} : vector<16x512xf32> -> vector<16x512xf32>
    %14 = arith.mulf %5, %13 : vector<16x512xf32>
    %15 = arith.mulf %14, %7 : vector<16x512xf32>
    %c0_9 = arith.constant 0 : index
    %c0_10 = arith.constant 0 : index
    %16 = vector.load %arg6[%c0_9, %c0_10] : memref<16x256xf32, #tpu.memory_space<vmem>>, vector<16x256xf32>
    %c0_11 = arith.constant 0 : index
    %c0_12 = arith.constant 0 : index
    %17 = vector.load %arg5[%c0_11, %c0_12] : memref<512x256xf32, #tpu.memory_space<vmem>>, vector<512x256xf32>
    %cst_13 = arith.constant dense<0.000000e+00> : vector<16x256xf32>
    %18 = tpu.matmul %15, %17, %cst_13 {dimension_numbers = #tpu.dot_dimension_numbers<[1], [0], [0], [1], [0, 0, 1, 1], [], []>} : vector<16x512xf32>, vector<512x256xf32>, vector<16x256xf32> -> vector<16x256xf32>
    %19 = arith.addf %16, %18 : vector<16x256xf32>
    %c0_14 = arith.constant 0 : index
    %c0_15 = arith.constant 0 : index
    %20 = vector.load %arg6[%c0_14, %c0_15] : memref<16x256xf32, #tpu.memory_space<vmem>>, vector<16x256xf32>
    tpu.vector_store %arg6[%c0_14, %c0_15], %19 {strides = array<i32>} : memref<16x256xf32, #tpu.memory_space<vmem>>, vector<16x256xf32>,
    return
  }
  func.func @transform_0(%arg0: i32, %arg1: i32) -> (i32, i32) {
    %c0_i32 = arith.constant 0 : i32
    %c0_i32_0 = arith.constant 0 : i32
    return %arg0, %c0_i32 : i32, i32
  }
  func.func @transform_1(%arg0: i32, %arg1: i32) -> (i32, i32) {
    %c0_i32 = arith.constant 0 : i32
    %c0_i32_0 = arith.constant 0 : i32
    return %c0_i32, %arg1 : i32, i32
  }
  func.func @transform_2(%arg0: i32, %arg1: i32) -> (i32, i32) {
    %c0_i32 = arith.constant 0 : i32
    %c0_i32_0 = arith.constant 0 : i32
    return %c0_i32, %arg1 : i32, i32
  }
  func.func @transform_3(%arg0: i32, %arg1: i32) -> (i32, i32) {
    %c0_i32 = arith.constant 0 : i32
    %c0_i32_0 = arith.constant 0 : i32
    return %arg1, %c0_i32 : i32, i32
  }
  func.func @transform_4(%arg0: i32, %arg1: i32) -> (i32, i32) {
    %c0_i32 = arith.constant 0 : i32
    %c0_i32_0 = arith.constant 0 : i32
    return %arg0, %c0_i32 : i32, i32
  }
}

</mosaic_0001>

<bundles_post_ra>
// kernel: tpu_custom_call.1
= control target key start
LH: loop header
LB: loop body
LE: loop exit
PB: predicated region body
PF: predicated region fallthrough
CT: control target
= control target key end

     0   :  { %9 = vsyncpa [#allocation3], 0  ;;  %s1450_s0 = inlined_call_operand.hbm [shape: f32[16,256], index: 0, kind: input, shape index: {}]   ;;  %s1451_s1 = inlined_call_operand.hbm [shape: f32[256,512], index: 1, kind: input, shape index: {}]   ;;  %s1452_s2 = inlined_call_operand.hbm [shape: f32[256,512], index: 2, kind: input, shape index: {}]   ;;  %s1453_s3 = inlined_call_operand.hbm [shape: f32[512,256], index: 3, kind: input, shape index: {}]   ;;  %s1454_s4 = inlined_call_operand.hbm [shape: f32[16,256], index: 4, kind: output, shape index: {}]  }
   0x1   :  { %10 = vsyncpa [#allocation6], 0 }
   0x2   :  { %11 = vsyncpa [#allocation9], 0  ;;  %s30_s17 = sshll.u32 %s1451_s1, 4  ;;  %s31_s17 = int_to_ptr.hbm [resolvable:$true] %s30_s17 }
   0x3   :  { %12 = vsyncpa [#allocation4], 0  ;;  %s1288_s18 = smov [#allocation5]   ;;  %s17_s22 = sshll.u32 %s1450_s0, 4  ;;  %s18_s22 = int_to_ptr.hbm [resolvable:$true] %s17_s22 }
   0x4   :  { %s32_s19 = sshll.u32 %s1288_s18, 4  ;;  %s1289_s23 = smov 512   ;;  %s33_s19 = int_to_ptr.vmem [resolvable:$true] %s32_s19 }
   0x5   :  { %s1290_s24 = smov 32   ;;  %s1291_s25 = smov [#allocation2]  }
   0x6   :  { %38 = dma.hbm_to_vmem [thread:$0]  %s31_s17, 16384, %s33_s19, [#allocation6], %s1289_s23, %s1289_s23, %s1290_s24  }
   0x7   :  { %s19_s26 = sshll.u32 %s1291_s25, 4  ;;  %s1292_s27 = smov 256   ;;  %s20_s26 = int_to_ptr.vmem [resolvable:$true] %s19_s26 }
   0x8   :  { %s1293_s28 = smov 16   ;;  %s43_s30 = sshll.u32 %s1452_s2, 4  ;;  %s44_s30 = int_to_ptr.hbm [resolvable:$true] %s43_s30 }
   0x9   :  { %25 = dma.hbm_to_vmem [thread:$0]  %s18_s22, 512, %s20_s26, [#allocation3], %s1292_s27, %s1292_s27, %s1293_s28  }
   0xa   :  { %s1294_s5 = smov [#allocation7]   ;;  %s56_s8 = sshll.u32 %s1453_s3, 4  ;;  %s57_s8 = int_to_ptr.hbm [resolvable:$true] %s56_s8 }
   0xb   :  { %s45_s0 = sshll.u32 %s1294_s5, 4  ;;  %s1295_s9 = smov [#allocation8]   ;;  %s46_s0 = int_to_ptr.vmem [resolvable:$true] %s45_s0 }
   0xc   :  { %51 = dma.hbm_to_vmem [thread:$0]  %s44_s30, 16384, %s46_s0, [#allocation6], %s1289_s23, %s1289_s23, %s1290_s24  }
   0xd   :  { %s58_s10 = sshll.u32 %s1295_s9, 4  ;;  %s59_s10 = int_to_ptr.vmem [resolvable:$true] %s58_s10 }
   0xe   :  { %64 = dma.hbm_to_vmem [thread:$0]  %s57_s8, 16384, %s59_s10, [#allocation9], %s1292_s27, %s1292_s27, %s1293_s28  }
   0xf   :  { %1280 = dma.done.wait [#allocation3], 512  }
  0x10   :  { %1281 = vsyncadd [#allocation3], 4294966784 }
  0x11   :  { %1282 = dma.done.wait [#allocation6], 32768  }
  0x12   :  { %1283 = vsyncadd [#allocation6], 4294934528 }
  0x13   :  { %1284 = dma.done.wait [#allocation9], 16384  }
  0x14   :  { %1285 = vsyncadd [#allocation9], 4294950912  ;;  %v153_v0 = vld [vmem:[#allocation5 + $0x1e0] sm:$0xff]  ;;  %v154_v2 = vld [vmem:[#allocation5 + $0x1e8] sm:$0xff]  ;;  %s1296_s2 = smov [#allocation10]   ;;  %s1103_s13 = sshll.u32 %s1454_s4, 4  ;;  %s1104_s13 = int_to_ptr.hbm [resolvable:$true] %s1103_s13 }
  0x15   :  { %v217_v1 = vld [vmem:[#allocation5 + $0x3e0] sm:$0xff]  ;;  %221 = vmatpush.msra.mxu0 %v153_v0  ;;  %v218_v3 = vld [vmem:[#allocation5 + $0x3e8] sm:$0xff]  ;;  %267 = vmatpush.msra.mxu2 %v154_v2  ;;  %v155_v0 = vld [vmem:[#allocation5 + $0x1f0] sm:$0xff]  ;;  %s1101_s3 = sshll.u32 %s1296_s2, 4  ;;  %s1102_s3 = int_to_ptr.vmem [resolvable:$true] %s1101_s3 }
  0x16   :  { %244 = vmatpush.msra.mxu1 %v217_v1  ;;  %v149_v4 = vld [vmem:[#allocation5 + $0x1c0] sm:$0xff]  ;;  %290 = vmatpush.msra.mxu3 %v218_v3  ;;  %v150_v6 = vld [vmem:[#allocation5 + $0x1c8] sm:$0xff]  ;;  %v219_v1 = vld [vmem:[#allocation5 + $0x3f0] sm:$0xff] }
  0x17   :  { %v213_v5 = vld [vmem:[#allocation5 + $0x3c0] sm:$0xff]  ;;  %v214_v7 = vld [vmem:[#allocation5 + $0x3c8] sm:$0xff]  ;;  %222 = vmatpush.msra.mxu0 %v149_v4  ;;  %268 = vmatpush.msra.mxu2 %v150_v6  ;;  %v156_v2 = vld [vmem:[#allocation5 + $0x1f8] sm:$0xff] }
  0x18   :  { %v145_v8 = vld [vmem:[#allocation5 + $0x1a0] sm:$0xff]  ;;  %245 = vmatpush.msra.mxu1 %v213_v5  ;;  %v146_v10 = vld [vmem:[#allocation5 + $0x1a8] sm:$0xff]  ;;  %291 = vmatpush.msra.mxu3 %v214_v7  ;;  %v220_v3 = vld [vmem:[#allocation5 + $0x3f8] sm:$0xff] }
  0x19   :  { %v209_v9 = vld [vmem:[#allocation5 + $0x3a0] sm:$0xff]  ;;  %v210_v11 = vld [vmem:[#allocation5 + $0x3a8] sm:$0xff]  ;;  %223 = vmatpush.msra.mxu0 %v145_v8  ;;  %269 = vmatpush.msra.mxu2 %v146_v10  ;;  %v151_v4 = vld [vmem:[#allocation5 + $0x1d0] sm:$0xff] }
  0x1a   :  { %v141_v12 = vld [vmem:[#allocation5 + $0x180] sm:$0xff]  ;;  %246 = vmatpush.msra.mxu1 %v209_v9  ;;  %v142_v14 = vld [vmem:[#allocation5 + $0x188] sm:$0xff]  ;;  %292 = vmatpush.msra.mxu3 %v210_v11  ;;  %v215_v5 = vld [vmem:[#allocation5 + $0x3d0] sm:$0xff] }
  0x1b   :  { %v205_v13 = vld [vmem:[#allocation5 + $0x380] sm:$0xff]  ;;  %v206_v15 = vld [vmem:[#allocation5 + $0x388] sm:$0xff]  ;;  %224 = vmatpush.msra.mxu0 %v141_v12  ;;  %270 = vmatpush.msra.mxu2 %v142_v14  ;;  %v152_v6 = vld [vmem:[#allocation5 + $0x1d8] sm:$0xff] }
  0x1c   :  { %v137_v16 = vld [vmem:[#allocation5 + $0x160] sm:$0xff]  ;;  %247 = vmatpush.msra.mxu1 %v205_v13  ;;  %v138_v18 = vld [vmem:[#allocation5 + $0x168] sm:$0xff]  ;;  %293 = vmatpush.msra.mxu3 %v206_v15  ;;  %v216_v7 = vld [vmem:[#allocation5 + $0x3d8] sm:$0xff] }
  0x1d   :  { %v201_v17 = vld [vmem:[#allocation5 + $0x360] sm:$0xff]  ;;  %v202_v19 = vld [vmem:[#allocation5 + $0x368] sm:$0xff]  ;;  %225 = vmatpush.msra.mxu0 %v137_v16  ;;  %271 = vmatpush.msra.mxu2 %v138_v18  ;;  %v147_v8 = vld [vmem:[#allocation5 + $0x1b0] sm:$0xff] }
  0x1e   :  { %v133_v20 = vld [vmem:[#allocation5 + $0x140] sm:$0xff]  ;;  %248 = vmatpush.msra.mxu1 %v201_v17  ;;  %v134_v22 = vld [vmem:[#allocation5 + $0x148] sm:$0xff]  ;;  %294 = vmatpush.msra.mxu3 %v202_v19  ;;  %v211_v9 = vld [vmem:[#allocation5 + $0x3b0] sm:$0xff] }
  0x1f   :  { %v197_v21 = vld [vmem:[#allocation5 + $0x340] sm:$0xff]  ;;  %v198_v23 = vld [vmem:[#allocation5 + $0x348] sm:$0xff]  ;;  %226 = vmatpush.msra.mxu0 %v133_v20  ;;  %272 = vmatpush.msra.mxu2 %v134_v22  ;;  %v148_v10 = vld [vmem:[#allocation5 + $0x1b8] sm:$0xff] }
  0x20   :  { %v129_v24 = vld [vmem:[#allocation5 + $0x120] sm:$0xff]  ;;  %249 = vmatpush.msra.mxu1 %v197_v21  ;;  %v130_v26 = vld [vmem:[#allocation5 + $0x128] sm:$0xff]  ;;  %295 = vmatpush.msra.mxu3 %v198_v23  ;;  %v212_v11 = vld [vmem:[#allocation5 + $0x3b8] sm:$0xff] }
  0x21   :  { %v193_v25 = vld [vmem:[#allocation5 + $0x320] sm:$0xff]  ;;  %v194_v27 = vld [vmem:[#allocation5 + $0x328] sm:$0xff]  ;;  %227 = vmatpush.msra.mxu0 %v129_v24  ;;  %273 = vmatpush.msra.mxu2 %v130_v26  ;;  %v143_v12 = vld [vmem:[#allocation5 + $0x190] sm:$0xff] }
  0x22   :  { %v125_v28 = vld [vmem:[#allocation5 + $0x100] sm:$0xff]  ;;  %250 = vmatpush.msra.mxu1 %v193_v25  ;;  %v126_v30 = vld [vmem:[#allocation5 + $0x108] sm:$0xff]  ;;  %296 = vmatpush.msra.mxu3 %v194_v27  ;;  %v207_v13 = vld [vmem:[#allocation5 + $0x390] sm:$0xff] }
  0x23   :  { %v189_v29 = vld [vmem:[#allocation5 + $0x300] sm:$0xff]  ;;  %v190_v31 = vld [vmem:[#allocation5 + $0x308] sm:$0xff]  ;;  %228 = vmatpush.msra.mxu0 %v125_v28  ;;  %274 = vmatpush.msra.mxu2 %v126_v30  ;;  %v144_v14 = vld [vmem:[#allocation5 + $0x198] sm:$0xff] }
  0x24   :  { %v121_v32 = vld [vmem:[#allocation5 + $0xe0] sm:$0xff]  ;;  %251 = vmatpush.msra.mxu1 %v189_v29  ;;  %v122_v34 = vld [vmem:[#allocation5 + $0xe8] sm:$0xff]  ;;  %297 = vmatpush.msra.mxu3 %v190_v31  ;;  %v208_v15 = vld [vmem:[#allocation5 + $0x398] sm:$0xff] }
  0x25   :  { %v185_v33 = vld [vmem:[#allocation5 + $0x2e0] sm:$0xff]  ;;  %v186_v35 = vld [vmem:[#allocation5 + $0x2e8] sm:$0xff]  ;;  %229 = vmatpush.msra.mxu0 %v121_v32  ;;  %275 = vmatpush.msra.mxu2 %v122_v34  ;;  %v139_v16 = vld [vmem:[#allocation5 + $0x170] sm:$0xff] }
  0x26   :  { %v117_v36 = vld [vmem:[#allocation5 + $0xc0] sm:$0xff]  ;;  %252 = vmatpush.msra.mxu1 %v185_v33  ;;  %v118_v38 = vld [vmem:[#allocation5 + $0xc8] sm:$0xff]  ;;  %298 = vmatpush.msra.mxu3 %v186_v35  ;;  %v203_v17 = vld [vmem:[#allocation5 + $0x370] sm:$0xff] }
  0x27   :  { %v181_v37 = vld [vmem:[#allocation5 + $0x2c0] sm:$0xff]  ;;  %v182_v39 = vld [vmem:[#allocation5 + $0x2c8] sm:$0xff]  ;;  %230 = vmatpush.msra.mxu0 %v117_v36  ;;  %276 = vmatpush.msra.mxu2 %v118_v38  ;;  %v140_v18 = vld [vmem:[#allocation5 + $0x178] sm:$0xff] }
  0x28   :  { %v113_v40 = vld [vmem:[#allocation5 + $0xa0] sm:$0xff]  ;;  %253 = vmatpush.msra.mxu1 %v181_v37  ;;  %v114_v42 = vld [vmem:[#allocation5 + $0xa8] sm:$0xff]  ;;  %299 = vmatpush.msra.mxu3 %v182_v39  ;;  %v204_v19 = vld [vmem:[#allocation5 + $0x378] sm:$0xff] }
  0x29   :  { %v177_v41 = vld [vmem:[#allocation5 + $0x2a0] sm:$0xff]  ;;  %v178_v43 = vld [vmem:[#allocation5 + $0x2a8] sm:$0xff]  ;;  %231 = vmatpush.msra.mxu0 %v113_v40  ;;  %277 = vmatpush.msra.mxu2 %v114_v42  ;;  %v135_v20 = vld [vmem:[#allocation5 + $0x150] sm:$0xff] }
  0x2a   :  { %v109_v44 = vld [vmem:[#allocation5 + $0x80] sm:$0xff]  ;;  %254 = vmatpush.msra.mxu1 %v177_v41  ;;  %v110_v46 = vld [vmem:[#allocation5 + $0x88] sm:$0xff]  ;;  %300 = vmatpush.msra.mxu3 %v178_v43  ;;  %v199_v21 = vld [vmem:[#allocation5 + $0x350] sm:$0xff] }
  0x2b   :  { %v173_v45 = vld [vmem:[#allocation5 + $0x280] sm:$0xff]  ;;  %v174_v47 = vld [vmem:[#allocation5 + $0x288] sm:$0xff]  ;;  %232 = vmatpush.msra.mxu0 %v109_v44  ;;  %278 = vmatpush.msra.mxu2 %v110_v46  ;;  %v136_v22 = vld [vmem:[#allocation5 + $0x158] sm:$0xff] }
  0x2c   :  { %v105_v48 = vld [vmem:[#allocation5 + $0x60] sm:$0xff]  ;;  %255 = vmatpush.msra.mxu1 %v173_v45  ;;  %v106_v50 = vld [vmem:[#allocation5 + $0x68] sm:$0xff]  ;;  %301 = vmatpush.msra.mxu3 %v174_v47  ;;  %v200_v23 = vld [vmem:[#allocation5 + $0x358] sm:$0xff] }
  0x2d   :  { %v169_v49 = vld [vmem:[#allocation5 + $0x260] sm:$0xff]  ;;  %v170_v51 = vld [vmem:[#allocation5 + $0x268] sm:$0xff]  ;;  %233 = vmatpush.msra.mxu0 %v105_v48  ;;  %279 = vmatpush.msra.mxu2 %v106_v50  ;;  %v131_v26 = vld [vmem:[#allocation5 + $0x130] sm:$0xff] }
  0x2e   :  { %v101_v52 = vld [vmem:[#allocation5 + $0x40] sm:$0xff]  ;;  %256 = vmatpush.msra.mxu1 %v169_v49  ;;  %v102_v54 = vld [vmem:[#allocation5 + $0x48] sm:$0xff]  ;;  %302 = vmatpush.msra.mxu3 %v170_v51  ;;  %v195_v27 = vld [vmem:[#allocation5 + $0x330] sm:$0xff] }
  0x2f   :  { %v165_v53 = vld [vmem:[#allocation5 + $0x240] sm:$0xff]  ;;  %v166_v55 = vld [vmem:[#allocation5 + $0x248] sm:$0xff]  ;;  %234 = vmatpush.msra.mxu0 %v101_v52  ;;  %280 = vmatpush.msra.mxu2 %v102_v54  ;;  %v132_v28 = vld [vmem:[#allocation5 + $0x138] sm:$0xff] }
  0x30   :  { %v97_v56 = vld [vmem:[#allocation5 + $0x20] sm:$0xff]  ;;  %257 = vmatpush.msra.mxu1 %v165_v53  ;;  %v98_v58 = vld [vmem:[#allocation5 + $0x28] sm:$0xff]  ;;  %303 = vmatpush.msra.mxu3 %v166_v55  ;;  %v196_v29 = vld [vmem:[#allocation5 + $0x338] sm:$0xff] }
  0x31   :  { %v161_v57 = vld [vmem:[#allocation5 + $0x220] sm:$0xff]  ;;  %v162_v59 = vld [vmem:[#allocation5 + $0x228] sm:$0xff]  ;;  %235 = vmatpush.msra.mxu0 %v97_v56  ;;  %281 = vmatpush.msra.mxu2 %v98_v58  ;;  %v127_v30 = vld [vmem:[#allocation5 + $0x110] sm:$0xff] }
  0x32   :  { %v93_v60 = vld [vmem:[#allocation5] sm:$0xff]  ;;  %258 = vmatpush.msra.mxu1 %v161_v57  ;;  %v94_v62 = vld [vmem:[#allocation5 + $0x8] sm:$0xff]  ;;  %304 = vmatpush.msra.mxu3 %v162_v59  ;;  %v191_v31 = vld [vmem:[#allocation5 + $0x310] sm:$0xff] }
  0x33   :  { %v157_v61 = vld [vmem:[#allocation5 + $0x200] sm:$0xff]  ;;  %v158_v63 = vld [vmem:[#allocation5 + $0x208] sm:$0xff]  ;;  %236 = vmatpush.msra.mxu0 %v93_v60  ;;  %282 = vmatpush.msra.mxu2 %v94_v62  ;;  %v128_v32 = vld [vmem:[#allocation5 + $0x118] sm:$0xff] }
  0x34   :  { %259 = vmatpush.msra.mxu1 %v157_v61  ;;  %305 = vmatpush.msra.mxu3 %v158_v63  ;;  %v1340_v24 = vld [vmem:[#allocation2] sm:$0xff]  ;;  %v1342_v25 = vld [vmem:[#allocation2 + $0x8] sm:$0xff]  ;;  %v192_v33 = vld [vmem:[#allocation5 + $0x318] sm:$0xff] }
  0x35   :  { %313 = vmatpush.msrb.mxu0 %v155_v0  ;;  %359 = vmatpush.msrb.mxu2 %v156_v2  ;;  %v123_v34 = vld [vmem:[#allocation5 + $0xf0] sm:$0xff]  ;;  %v124_v36 = vld [vmem:[#allocation5 + $0xf8] sm:$0xff]  ;;  %v465_v2 = vld [vmem:[#allocation7 + $0x1e0] sm:$0xff] }
  0x36   :  { %336 = vmatpush.msrb.mxu1 %v219_v1  ;;  %382 = vmatpush.msrb.mxu3 %v220_v3  ;;  %v187_v35 = vld [vmem:[#allocation5 + $0x2f0] sm:$0xff]  ;;  %v188_v37 = vld [vmem:[#allocation5 + $0x2f8] sm:$0xff]  ;;  %v529_v3 = vld [vmem:[#allocation7 + $0x3e0] sm:$0xff] }
  0x37   :  { %314 = vmatpush.msrb.mxu0 %v151_v4  ;;  %360 = vmatpush.msrb.mxu2 %v152_v6  ;;  %v119_v38 = vld [vmem:[#allocation5 + $0xd0] sm:$0xff]  ;;  %v120_v40 = vld [vmem:[#allocation5 + $0xd8] sm:$0xff]  ;;  %v466_v4 = vld [vmem:[#allocation7 + $0x1e8] sm:$0xff] }
  0x38   :  { %337 = vmatpush.msrb.mxu1 %v215_v5  ;;  %383 = vmatpush.msrb.mxu3 %v216_v7  ;;  %v183_v39 = vld [vmem:[#allocation5 + $0x2d0] sm:$0xff]  ;;  %v184_v41 = vld [vmem:[#allocation5 + $0x2d8] sm:$0xff]  ;;  %v530_v5 = vld [vmem:[#allocation7 + $0x3e8] sm:$0xff] }
  0x39   :  { %315 = vmatpush.msrb.mxu0 %v147_v8  ;;  %361 = vmatpush.msrb.mxu2 %v148_v10  ;;  %v115_v42 = vld [vmem:[#allocation5 + $0xb0] sm:$0xff]  ;;  %v116_v44 = vld [vmem:[#allocation5 + $0xb8] sm:$0xff]  ;;  %v461_v8 = vld [vmem:[#allocation7 + $0x1c0] sm:$0xff] }
  0x3a   :  { %338 = vmatpush.msrb.mxu1 %v211_v9  ;;  %384 = vmatpush.msrb.mxu3 %v212_v11  ;;  %v179_v43 = vld [vmem:[#allocation5 + $0x2b0] sm:$0xff]  ;;  %v180_v45 = vld [vmem:[#allocation5 + $0x2b8] sm:$0xff]  ;;  %v525_v9 = vld [vmem:[#allocation7 + $0x3c0] sm:$0xff] }
  0x3b   :  { %316 = vmatpush.msrb.mxu0 %v143_v12  ;;  %362 = vmatpush.msrb.mxu2 %v144_v14  ;;  %v111_v46 = vld [vmem:[#allocation5 + $0x90] sm:$0xff]  ;;  %v112_v48 = vld [vmem:[#allocation5 + $0x98] sm:$0xff]  ;;  %v462_v10 = vld [vmem:[#allocation7 + $0x1c8] sm:$0xff] }
  0x3c   :  { %339 = vmatpush.msrb.mxu1 %v207_v13  ;;  %385 = vmatpush.msrb.mxu3 %v208_v15  ;;  %v175_v47 = vld [vmem:[#allocation5 + $0x290] sm:$0xff]  ;;  %v176_v49 = vld [vmem:[#allocation5 + $0x298] sm:$0xff]  ;;  %v526_v11 = vld [vmem:[#allocation7 + $0x3c8] sm:$0xff] }
  0x3d   :  { %317 = vmatpush.msrb.mxu0 %v139_v16  ;;  %363 = vmatpush.msrb.mxu2 %v140_v18  ;;  %v107_v50 = vld [vmem:[#allocation5 + $0x70] sm:$0xff]  ;;  %v108_v52 = vld [vmem:[#allocation5 + $0x78] sm:$0xff]  ;;  %v457_v12 = vld [vmem:[#allocation7 + $0x1a0] sm:$0xff] }
  0x3e   :  { %340 = vmatpush.msrb.mxu1 %v203_v17  ;;  %386 = vmatpush.msrb.mxu3 %v204_v19  ;;  %v171_v51 = vld [vmem:[#allocation5 + $0x270] sm:$0xff]  ;;  %v172_v53 = vld [vmem:[#allocation5 + $0x278] sm:$0xff]  ;;  %v521_v13 = vld [vmem:[#allocation7 + $0x3a0] sm:$0xff] }
  0x3f   :  { %318 = vmatpush.msrb.mxu0 %v135_v20  ;;  %364 = vmatpush.msrb.mxu2 %v136_v22  ;;  %v103_v54 = vld [vmem:[#allocation5 + $0x50] sm:$0xff]  ;;  %v104_v56 = vld [vmem:[#allocation5 + $0x58] sm:$0xff]  ;;  %v458_v14 = vld [vmem:[#allocation7 + $0x1a8] sm:$0xff] }
  0x40   :  { %341 = vmatpush.msrb.mxu1 %v199_v21  ;;  %387 = vmatpush.msrb.mxu3 %v200_v23  ;;  %v167_v55 = vld [vmem:[#allocation5 + $0x250] sm:$0xff]  ;;  %v168_v57 = vld [vmem:[#allocation5 + $0x258] sm:$0xff]  ;;  %v522_v15 = vld [vmem:[#allocation7 + $0x3a8] sm:$0xff] }
  0x41   :  { %283 = vmatmul.f32.vlgmr.msra.gmra.mxu2 %v1340_v24  ;;  %306 = vmatmul.f32.vlgmr.msra.gmra.mxu3 %v1342_v25  ;;  %v99_v58 = vld [vmem:[#allocation5 + $0x30] sm:$0xff]  ;;  %v100_v60 = vld [vmem:[#allocation5 + $0x38] sm:$0xff]  ;;  %v453_v16 = vld [vmem:[#allocation7 + $0x180] sm:$0xff] }
  0x42   :  { %319 = vmatpush.msrb.mxu0 %v131_v26  ;;  %342 = vmatpush.msrb.mxu1 %v195_v27  ;;  %v163_v59 = vld [vmem:[#allocation5 + $0x230] sm:$0xff]  ;;  %v164_v61 = vld [vmem:[#allocation5 + $0x238] sm:$0xff]  ;;  %v517_v17 = vld [vmem:[#allocation7 + $0x380] sm:$0xff] }
  0x43   :  { %365 = vmatpush.msrb.mxu2 %v132_v28  ;;  %388 = vmatpush.msrb.mxu3 %v196_v29  ;;  %v95_v62 = vld [vmem:[#allocation5 + $0x10] sm:$0xff]  ;;  %v96_v0 = vld [vmem:[#allocation5 + $0x18] sm:$0xff]  ;;  %v454_v18 = vld [vmem:[#allocation7 + $0x188] sm:$0xff] }
  0x44   :  { %320 = vmatpush.msrb.mxu0 %v127_v30  ;;  %343 = vmatpush.msrb.mxu1 %v191_v31  ;;  %v159_v63 = vld [vmem:[#allocation5 + $0x210] sm:$0xff]  ;;  %v160_v1 = vld [vmem:[#allocation5 + $0x218] sm:$0xff]  ;;  %v518_v19 = vld [vmem:[#allocation7 + $0x388] sm:$0xff] }
  0x45   :  { %366 = vmatpush.msrb.mxu2 %v128_v32  ;;  %389 = vmatpush.msrb.mxu3 %v192_v33  ;;  %v1348_v6 = vld [vmem:[#allocation2 + $0x10] sm:$0xff]  ;;  %v1350_v7 = vld [vmem:[#allocation2 + $0x18] sm:$0xff]  ;;  %v449_v20 = vld [vmem:[#allocation7 + $0x160] sm:$0xff] }
  0x46   :  { %237 = vmatmul.f32.vlgmr.msra.gmra.mxu0 %v1340_v24  ;;  %260 = vmatmul.f32.vlgmr.msra.gmra.mxu1 %v1342_v25  ;;  %v513_v21 = vld [vmem:[#allocation7 + $0x360] sm:$0xff]  ;;  %v450_v22 = vld [vmem:[#allocation7 + $0x168] sm:$0xff] }
  0x47   :  { %321 = vmatpush.msrb.mxu0 %v123_v34  ;;  %344 = vmatpush.msrb.mxu1 %v187_v35  ;;  %v514_v23 = vld [vmem:[#allocation7 + $0x368] sm:$0xff]  ;;  %v445_v26 = vld [vmem:[#allocation7 + $0x140] sm:$0xff] }
  0x48   :  { %367 = vmatpush.msrb.mxu2 %v124_v36  ;;  %390 = vmatpush.msrb.mxu3 %v188_v37  ;;  %v509_v27 = vld [vmem:[#allocation7 + $0x340] sm:$0xff]  ;;  %v446_v28 = vld [vmem:[#allocation7 + $0x148] sm:$0xff] }
  0x49   :  { %322 = vmatpush.msrb.mxu0 %v119_v38  ;;  %345 = vmatpush.msrb.mxu1 %v183_v39  ;;  %v510_v29 = vld [vmem:[#allocation7 + $0x348] sm:$0xff]  ;;  %v441_v30 = vld [vmem:[#allocation7 + $0x120] sm:$0xff] }
  0x4a   :  { %368 = vmatpush.msrb.mxu2 %v120_v40  ;;  %391 = vmatpush.msrb.mxu3 %v184_v41  ;;  %v505_v31 = vld [vmem:[#allocation7 + $0x320] sm:$0xff]  ;;  %v442_v32 = vld [vmem:[#allocation7 + $0x128] sm:$0xff] }
  0x4b   :  { %323 = vmatpush.msrb.mxu0 %v115_v42  ;;  %346 = vmatpush.msrb.mxu1 %v179_v43  ;;  %v506_v33 = vld [vmem:[#allocation7 + $0x328] sm:$0xff]  ;;  %v437_v34 = vld [vmem:[#allocation7 + $0x100] sm:$0xff] }
  0x4c   :  { %369 = vmatpush.msrb.mxu2 %v116_v44  ;;  %392 = vmatpush.msrb.mxu3 %v180_v45  ;;  %v501_v35 = vld [vmem:[#allocation7 + $0x300] sm:$0xff]  ;;  %v438_v36 = vld [vmem:[#allocation7 + $0x108] sm:$0xff] }
  0x4d   :  { %324 = vmatpush.msrb.mxu0 %v111_v46  ;;  %347 = vmatpush.msrb.mxu1 %v175_v47  ;;  %v502_v37 = vld [vmem:[#allocation7 + $0x308] sm:$0xff]  ;;  %v433_v38 = vld [vmem:[#allocation7 + $0xe0] sm:$0xff] }
  0x4e   :  { %370 = vmatpush.msrb.mxu2 %v112_v48  ;;  %393 = vmatpush.msrb.mxu3 %v176_v49  ;;  %v497_v39 = vld [vmem:[#allocation7 + $0x2e0] sm:$0xff]  ;;  %v434_v40 = vld [vmem:[#allocation7 + $0xe8] sm:$0xff] }
  0x4f   :  { %325 = vmatpush.msrb.mxu0 %v107_v50  ;;  %348 = vmatpush.msrb.mxu1 %v171_v51  ;;  %v498_v41 = vld [vmem:[#allocation7 + $0x2e8] sm:$0xff]  ;;  %v429_v42 = vld [vmem:[#allocation7 + $0xc0] sm:$0xff] }
  0x50   :  { %371 = vmatpush.msrb.mxu2 %v108_v52  ;;  %394 = vmatpush.msrb.mxu3 %v172_v53  ;;  %v493_v43 = vld [vmem:[#allocation7 + $0x2c0] sm:$0xff]  ;;  %v430_v44 = vld [vmem:[#allocation7 + $0xc8] sm:$0xff] }
  0x51   :  { %326 = vmatpush.msrb.mxu0 %v103_v54  ;;  %349 = vmatpush.msrb.mxu1 %v167_v55  ;;  %v494_v45 = vld [vmem:[#allocation7 + $0x2c8] sm:$0xff]  ;;  %v425_v46 = vld [vmem:[#allocation7 + $0xa0] sm:$0xff] }
  0x52   :  { %372 = vmatpush.msrb.mxu2 %v104_v56  ;;  %395 = vmatpush.msrb.mxu3 %v168_v57  ;;  %v489_v47 = vld [vmem:[#allocation7 + $0x2a0] sm:$0xff]  ;;  %v426_v48 = vld [vmem:[#allocation7 + $0xa8] sm:$0xff] }
  0x53   :  { %327 = vmatpush.msrb.mxu0 %v99_v58  ;;  %350 = vmatpush.msrb.mxu1 %v163_v59  ;;  %v490_v49 = vld [vmem:[#allocation7 + $0x2a8] sm:$0xff]  ;;  %v421_v50 = vld [vmem:[#allocation7 + $0x80] sm:$0xff] }
  0x54   :  { %373 = vmatpush.msrb.mxu2 %v100_v60  ;;  %396 = vmatpush.msrb.mxu3 %v164_v61  ;;  %v485_v51 = vld [vmem:[#allocation7 + $0x280] sm:$0xff]  ;;  %v422_v52 = vld [vmem:[#allocation7 + $0x88] sm:$0xff] }
  0x55   :  { %328 = vmatpush.msrb.mxu0 %v95_v62  ;;  %351 = vmatpush.msrb.mxu1 %v159_v63  ;;  %v486_v53 = vld [vmem:[#allocation7 + $0x288] sm:$0xff]  ;;  %v417_v54 = vld [vmem:[#allocation7 + $0x60] sm:$0xff] }
  0x56   :  { %374 = vmatpush.msrb.mxu2 %v96_v0  ;;  %397 = vmatpush.msrb.mxu3 %v160_v1  ;;  %v481_v55 = vld [vmem:[#allocation7 + $0x260] sm:$0xff]  ;;  %v418_v56 = vld [vmem:[#allocation7 + $0x68] sm:$0xff] }
  0x57   :  { %533 = vmatpush.msra.mxu0 %v465_v2  ;;  %556 = vmatpush.msra.mxu1 %v529_v3  ;;  %v482_v57 = vld [vmem:[#allocation7 + $0x268] sm:$0xff]  ;;  %v413_v58 = vld [vmem:[#allocation7 + $0x40] sm:$0xff] }
  0x58   :  { %579 = vmatpush.msra.mxu2 %v466_v4  ;;  %602 = vmatpush.msra.mxu3 %v530_v5  ;;  %v477_v59 = vld [vmem:[#allocation7 + $0x240] sm:$0xff]  ;;  %v414_v60 = vld [vmem:[#allocation7 + $0x48] sm:$0xff] }
  0x59   :  { %286 = vmatmul.f32.gmra.mxu2 %v1348_v6  ;;  %309 = vmatmul.f32.gmra.mxu3 %v1350_v7  ;;  %v478_v61 = vld [vmem:[#allocation7 + $0x248] sm:$0xff]  ;;  %v409_v62 = vld [vmem:[#allocation7 + $0x20] sm:$0xff] }
  0x5a   :  { %534 = vmatpush.msra.mxu0 %v461_v8  ;;  %557 = vmatpush.msra.mxu1 %v525_v9  ;;  %v473_v63 = vld [vmem:[#allocation7 + $0x220] sm:$0xff]  ;;  %v410_v0 = vld [vmem:[#allocation7 + $0x28] sm:$0xff]  ;;  %v467_v8 = vld [vmem:[#allocation7 + $0x1f0] sm:$0xff] }
  0x5b   :  { %580 = vmatpush.msra.mxu2 %v462_v10  ;;  %603 = vmatpush.msra.mxu3 %v526_v11  ;;  %v474_v1 = vld [vmem:[#allocation7 + $0x228] sm:$0xff]  ;;  %v405_v2 = vld [vmem:[#allocation7] sm:$0xff]  ;;  %v531_v9 = vld [vmem:[#allocation7 + $0x3f0] sm:$0xff] }
  0x5c   :  { %535 = vmatpush.msra.mxu0 %v457_v12  ;;  %558 = vmatpush.msra.mxu1 %v521_v13  ;;  %v469_v3 = vld [vmem:[#allocation7 + $0x200] sm:$0xff]  ;;  %v406_v4 = vld [vmem:[#allocation7 + $0x8] sm:$0xff]  ;;  %v468_v10 = vld [vmem:[#allocation7 + $0x1f8] sm:$0xff] }
  0x5d   :  { %581 = vmatpush.msra.mxu2 %v458_v14  ;;  %604 = vmatpush.msra.mxu3 %v522_v15  ;;  %v470_v5 = vld [vmem:[#allocation7 + $0x208] sm:$0xff]  ;;  %v532_v11 = vld [vmem:[#allocation7 + $0x3f8] sm:$0xff]  ;;  %v463_v12 = vld [vmem:[#allocation7 + $0x1d0] sm:$0xff] }
  0x5e   :  { %240 = vmatmul.f32.gmra.mxu0 %v1348_v6  ;;  %263 = vmatmul.f32.gmra.mxu1 %v1350_v7  ;;  %v527_v13 = vld [vmem:[#allocation7 + $0x3d0] sm:$0xff]  ;;  %v464_v14 = vld [vmem:[#allocation7 + $0x1d8] sm:$0xff] }
  0x5f   :  { %536 = vmatpush.msra.mxu0 %v453_v16  ;;  %559 = vmatpush.msra.mxu1 %v517_v17  ;;  %v528_v15 = vld [vmem:[#allocation7 + $0x3d8] sm:$0xff]  ;;  %v459_v16 = vld [vmem:[#allocation7 + $0x1b0] sm:$0xff] }
  0x60   :  { %582 = vmatpush.msra.mxu2 %v454_v18  ;;  %605 = vmatpush.msra.mxu3 %v518_v19  ;;  %v523_v17 = vld [vmem:[#allocation7 + $0x3b0] sm:$0xff]  ;;  %v460_v18 = vld [vmem:[#allocation7 + $0x1b8] sm:$0xff] }
  0x61   :  { %537 = vmatpush.msra.mxu0 %v449_v20  ;;  %560 = vmatpush.msra.mxu1 %v513_v21  ;;  %v524_v19 = vld [vmem:[#allocation7 + $0x3b8] sm:$0xff]  ;;  %v455_v20 = vld [vmem:[#allocation7 + $0x190] sm:$0xff] }
  0x62   :  { %583 = vmatpush.msra.mxu2 %v450_v22  ;;  %606 = vmatpush.msra.mxu3 %v514_v23  ;;  %v519_v21 = vld [vmem:[#allocation7 + $0x390] sm:$0xff]  ;;  %v456_v22 = vld [vmem:[#allocation7 + $0x198] sm:$0xff] }
  0x63   :  { %375 = vmatmul.f32.vlgmr.msrb.gmra.mxu2 %v1340_v24  ;;  %398 = vmatmul.f32.vlgmr.msrb.gmra.mxu3 %v1342_v25  ;;  %v520_v23 = vld [vmem:[#allocation7 + $0x398] sm:$0xff] }
  0x64   :  { %538 = vmatpush.msra.mxu0 %v445_v26  ;;  %561 = vmatpush.msra.mxu1 %v509_v27  ;;  %v451_v26 = vld [vmem:[#allocation7 + $0x170] sm:$0xff] }
  0x65   :  { %584 = vmatpush.msra.mxu2 %v446_v28  ;;  %607 = vmatpush.msra.mxu3 %v510_v29  ;;  %v515_v27 = vld [vmem:[#allocation7 + $0x370] sm:$0xff]  ;;  %v452_v28 = vld [vmem:[#allocation7 + $0x178] sm:$0xff] }
  0x66   :  { %539 = vmatpush.msra.mxu0 %v441_v30  ;;  %562 = vmatpush.msra.mxu1 %v505_v31  ;;  %v516_v29 = vld [vmem:[#allocation7 + $0x378] sm:$0xff]  ;;  %v447_v30 = vld [vmem:[#allocation7 + $0x150] sm:$0xff] }
  0x67   :  { %585 = vmatpush.msra.mxu2 %v442_v32  ;;  %608 = vmatpush.msra.mxu3 %v506_v33  ;;  %v511_v31 = vld [vmem:[#allocation7 + $0x350] sm:$0xff]  ;;  %v448_v32 = vld [vmem:[#allocation7 + $0x158] sm:$0xff] }
  0x68   :  { %329 = vmatmul.f32.vlgmr.msrb.gmra.mxu0 %v1340_v24  ;;  %352 = vmatmul.f32.vlgmr.msrb.gmra.mxu1 %v1342_v25  ;;  %v512_v33 = vld [vmem:[#allocation7 + $0x358] sm:$0xff] }
  0x69   :  { %540 = vmatpush.msra.mxu0 %v437_v34  ;;  %563 = vmatpush.msra.mxu1 %v501_v35  ;;  %v443_v34 = vld [vmem:[#allocation7 + $0x130] sm:$0xff] }
  0x6a   :  { %586 = vmatpush.msra.mxu2 %v438_v36  ;;  %609 = vmatpush.msra.mxu3 %v502_v37  ;;  %v507_v35 = vld [vmem:[#allocation7 + $0x330] sm:$0xff]  ;;  %v444_v36 = vld [vmem:[#allocation7 + $0x138] sm:$0xff] }
  0x6b   :  { %541 = vmatpush.msra.mxu0 %v433_v38  ;;  %564 = vmatpush.msra.mxu1 %v497_v39  ;;  %v508_v37 = vld [vmem:[#allocation7 + $0x338] sm:$0xff]  ;;  %v439_v38 = vld [vmem:[#allocation7 + $0x110] sm:$0xff] }
  0x6c   :  { %587 = vmatpush.msra.mxu2 %v434_v40  ;;  %610 = vmatpush.msra.mxu3 %v498_v41  ;;  %v503_v39 = vld [vmem:[#allocation7 + $0x310] sm:$0xff]  ;;  %v440_v40 = vld [vmem:[#allocation7 + $0x118] sm:$0xff] }
  0x6d   :  { %378 = vmatmul.f32.gmra.mxu2 %v1348_v6  ;;  %401 = vmatmul.f32.gmra.mxu3 %v1350_v7  ;;  %v504_v41 = vld [vmem:[#allocation7 + $0x318] sm:$0xff] }
  0x6e   :  { %542 = vmatpush.msra.mxu0 %v429_v42  ;;  %565 = vmatpush.msra.mxu1 %v493_v43  ;;  %v435_v42 = vld [vmem:[#allocation7 + $0xf0] sm:$0xff] }
  0x6f   :  { %588 = vmatpush.msra.mxu2 %v430_v44  ;;  %611 = vmatpush.msra.mxu3 %v494_v45  ;;  %v499_v43 = vld [vmem:[#allocation7 + $0x2f0] sm:$0xff]  ;;  %v436_v44 = vld [vmem:[#allocation7 + $0xf8] sm:$0xff] }
  0x70   :  { %543 = vmatpush.msra.mxu0 %v425_v46  ;;  %566 = vmatpush.msra.mxu1 %v489_v47  ;;  %v500_v45 = vld [vmem:[#allocation7 + $0x2f8] sm:$0xff]  ;;  %v431_v46 = vld [vmem:[#allocation7 + $0xd0] sm:$0xff] }
  0x71   :  { %589 = vmatpush.msra.mxu2 %v426_v48  ;;  %612 = vmatpush.msra.mxu3 %v490_v49  ;;  %v495_v47 = vld [vmem:[#allocation7 + $0x2d0] sm:$0xff]  ;;  %v432_v48 = vld [vmem:[#allocation7 + $0xd8] sm:$0xff] }
  0x72   :  { %332 = vmatmul.f32.gmra.mxu0 %v1348_v6  ;;  %355 = vmatmul.f32.gmra.mxu1 %v1350_v7  ;;  %v496_v49 = vld [vmem:[#allocation7 + $0x2d8] sm:$0xff] }
  0x73   :  { %544 = vmatpush.msra.mxu0 %v421_v50  ;;  %567 = vmatpush.msra.mxu1 %v485_v51  ;;  %v427_v50 = vld [vmem:[#allocation7 + $0xb0] sm:$0xff] }
  0x74   :  { %590 = vmatpush.msra.mxu2 %v422_v52  ;;  %613 = vmatpush.msra.mxu3 %v486_v53  ;;  %v491_v51 = vld [vmem:[#allocation7 + $0x2b0] sm:$0xff]  ;;  %v428_v52 = vld [vmem:[#allocation7 + $0xb8] sm:$0xff] }
  0x75   :  { %545 = vmatpush.msra.mxu0 %v417_v54  ;;  %568 = vmatpush.msra.mxu1 %v481_v55  ;;  %v492_v53 = vld [vmem:[#allocation7 + $0x2b8] sm:$0xff]  ;;  %v423_v54 = vld [vmem:[#allocation7 + $0x90] sm:$0xff] }
  0x76   :  { %591 = vmatpush.msra.mxu2 %v418_v56  ;;  %614 = vmatpush.msra.mxu3 %v482_v57  ;;  %v487_v55 = vld [vmem:[#allocation7 + $0x290] sm:$0xff]  ;;  %v424_v56 = vld [vmem:[#allocation7 + $0x98] sm:$0xff] }
  0x77   :  { %546 = vmatpush.msra.mxu0 %v413_v58  ;;  %569 = vmatpush.msra.mxu1 %v477_v59  ;;  %v488_v57 = vld [vmem:[#allocation7 + $0x298] sm:$0xff]  ;;  %v419_v58 = vld [vmem:[#allocation7 + $0x70] sm:$0xff] }
  0x78   :  { %592 = vmatpush.msra.mxu2 %v414_v60  ;;  %615 = vmatpush.msra.mxu3 %v478_v61  ;;  %v483_v59 = vld [vmem:[#allocation7 + $0x270] sm:$0xff]  ;;  %v420_v60 = vld [vmem:[#allocation7 + $0x78] sm:$0xff] }
  0x79   :  { %547 = vmatpush.msra.mxu0 %v409_v62  ;;  %570 = vmatpush.msra.mxu1 %v473_v63  ;;  %v484_v61 = vld [vmem:[#allocation7 + $0x278] sm:$0xff]  ;;  %v415_v62 = vld [vmem:[#allocation7 + $0x50] sm:$0xff] }
  0x7a   :  { %593 = vmatpush.msra.mxu2 %v410_v0  ;;  %616 = vmatpush.msra.mxu3 %v474_v1  ;;  %v479_v63 = vld [vmem:[#allocation7 + $0x250] sm:$0xff]  ;;  %v416_v0 = vld [vmem:[#allocation7 + $0x58] sm:$0xff] }
  0x7b   :  { %548 = vmatpush.msra.mxu0 %v405_v2  ;;  %571 = vmatpush.msra.mxu1 %v469_v3  ;;  %v480_v1 = vld [vmem:[#allocation7 + $0x258] sm:$0xff]  ;;  %v411_v2 = vld [vmem:[#allocation7 + $0x30] sm:$0xff] }
  0x7c   :  { %594 = vmatpush.msra.mxu2 %v406_v4  ;;  %617 = vmatpush.msra.mxu3 %v470_v5  ;;  %v475_v3 = vld [vmem:[#allocation7 + $0x230] sm:$0xff]  ;;  %v412_v4 = vld [vmem:[#allocation7 + $0x38] sm:$0xff] }
  0x7d   :  { %549 = vmatmul.f32.vlgmr.msra.gmra.mxu0 %v1340_v24  ;;  %572 = vmatmul.f32.vlgmr.msra.gmra.mxu1 %v1342_v25  ;;  %v476_v5 = vld [vmem:[#allocation7 + $0x238] sm:$0xff] }
  0x7e   :  { %595 = vmatmul.f32.vlgmr.msra.gmra.mxu2 %v1340_v24  ;;  %618 = vmatmul.f32.vlgmr.msra.gmra.mxu3 %v1342_v25 }
  0x7f   :  { %625 = vmatpush.msrb.mxu0 %v467_v8  ;;  %648 = vmatpush.msrb.mxu1 %v531_v9  ;;  %v407_v8 = vld [vmem:[#allocation7 + $0x10] sm:$0xff] }
  0x80   :  { %671 = vmatpush.msrb.mxu2 %v468_v10  ;;  %694 = vmatpush.msrb.mxu3 %v532_v11  ;;  %v471_v9 = vld [vmem:[#allocation7 + $0x210] sm:$0xff]  ;;  %v408_v10 = vld [vmem:[#allocation7 + $0x18] sm:$0xff] }
  0x81   :  { %626 = vmatpush.msrb.mxu0 %v463_v12  ;;  %649 = vmatpush.msrb.mxu1 %v527_v13  ;;  %v472_v11 = vld [vmem:[#allocation7 + $0x218] sm:$0xff]  ;;  %v807_v12 = vld [vmem:[#allocation8 + $0xf0] sm:$0xff]  ;;  %v805_v13 = vld [vmem:[#allocation8 + $0xe0] sm:$0xff] }
  0x82   :  { %672 = vmatpush.msrb.mxu2 %v464_v14  ;;  %695 = vmatpush.msrb.mxu3 %v528_v15  ;;  %v803_v14 = vld [vmem:[#allocation8 + $0xd0] sm:$0xff]  ;;  %v801_v15 = vld [vmem:[#allocation8 + $0xc0] sm:$0xff] }
  0x83   :  { %627 = vmatpush.msrb.mxu0 %v459_v16  ;;  %650 = vmatpush.msrb.mxu1 %v523_v17  ;;  %v839_v16 = vld [vmem:[#allocation8 + $0x1f0] sm:$0xff]  ;;  %v837_v17 = vld [vmem:[#allocation8 + $0x1e0] sm:$0xff] }
  0x84   :  { %673 = vmatpush.msrb.mxu2 %v460_v18  ;;  %696 = vmatpush.msrb.mxu3 %v524_v19  ;;  %v797_v18 = vld [vmem:[#allocation8 + $0xa0] sm:$0xff] }
  0x85   :  { %628 = vmatpush.msrb.mxu0 %v455_v20  ;;  %651 = vmatpush.msrb.mxu1 %v519_v21  ;;  %v833_v19 = vld [vmem:[#allocation8 + $0x1c0] sm:$0xff]  ;;  %v791_v21 = vld [vmem:[#allocation8 + $0x70] sm:$0xff] }
  0x86   :  { %674 = vmatpush.msrb.mxu2 %v456_v22  ;;  %697 = vmatpush.msrb.mxu3 %v520_v23  ;;  %v793_v20 = vld [vmem:[#allocation8 + $0x80] sm:$0xff] }
  0x87   :  { %552 = vmatmul.f32.gmra.mxu0 %v1348_v6  ;;  %575 = vmatmul.f32.gmra.mxu1 %v1350_v7  ;;  %v829_v22 = vld [vmem:[#allocation8 + $0x1a0] sm:$0xff] }
  0x88   :  { %598 = vmatmul.f32.gmra.mxu2 %v1348_v6  ;;  %621 = vmatmul.f32.gmra.mxu3 %v1350_v7  ;;  %v789_v23 = vld [vmem:[#allocation8 + $0x60] sm:$0xff] }
  0x89   :  { %629 = vmatpush.msrb.mxu0 %v451_v26  ;;  %652 = vmatpush.msrb.mxu1 %v515_v27  ;;  %v827_v26 = vld [vmem:[#allocation8 + $0x190] sm:$0xff] }
  0x8a   :  { %675 = vmatpush.msrb.mxu2 %v452_v28  ;;  %698 = vmatpush.msrb.mxu3 %v516_v29  ;;  %v787_v27 = vld [vmem:[#allocation8 + $0x50] sm:$0xff]  ;;  %v825_v28 = vld [vmem:[#allocation8 + $0x180] sm:$0xff] }
  0x8b   :  { %630 = vmatpush.msrb.mxu0 %v447_v30  ;;  %653 = vmatpush.msrb.mxu1 %v511_v31  ;;  %v785_v29 = vld [vmem:[#allocation8 + $0x40] sm:$0xff]  ;;  %v823_v30 = vld [vmem:[#allocation8 + $0x170] sm:$0xff] }
  0x8c   :  { %676 = vmatpush.msrb.mxu2 %v448_v32  ;;  %699 = vmatpush.msrb.mxu3 %v512_v33  ;;  %v783_v31 = vld [vmem:[#allocation8 + $0x30] sm:$0xff]  ;;  %v821_v32 = vld [vmem:[#allocation8 + $0x160] sm:$0xff] }
  0x8d   :  { %631 = vmatpush.msrb.mxu0 %v443_v34  ;;  %654 = vmatpush.msrb.mxu1 %v507_v35  ;;  %v781_v33 = vld [vmem:[#allocation8 + $0x20] sm:$0xff]  ;;  %v819_v34 = vld [vmem:[#allocation8 + $0x150] sm:$0xff] }
  0x8e   :  { %677 = vmatpush.msrb.mxu2 %v444_v36  ;;  %700 = vmatpush.msrb.mxu3 %v508_v37  ;;  %v779_v35 = vld [vmem:[#allocation8 + $0x10] sm:$0xff]  ;;  %v817_v36 = vld [vmem:[#allocation8 + $0x140] sm:$0xff] }
  0x8f   :  { %632 = vmatpush.msrb.mxu0 %v439_v38  ;;  %655 = vmatpush.msrb.mxu1 %v503_v39  ;;  %v777_v39 = vld [vmem:[#allocation8] sm:$0xff] }
  0x90   :  { %678 = vmatpush.msrb.mxu2 %v440_v40  ;;  %701 = vmatpush.msrb.mxu3 %v504_v41  ;;  %v815_v40 = vld [vmem:[#allocation8 + $0x130] sm:$0xff] }
  0x91   :  { %633 = vmatpush.msrb.mxu0 %v435_v42  ;;  %656 = vmatpush.msrb.mxu1 %v499_v43  ;;  %v871_v41 = vld [vmem:[#allocation8 + $0x2f0] sm:$0xff]  ;;  %v808_v42 = vld [vmem:[#allocation8 + $0xf8] sm:$0xff]  ;;  %v813_v43 = vld [vmem:[#allocation8 + $0x120] sm:$0xff] }
  0x92   :  { %679 = vmatpush.msrb.mxu2 %v436_v44  ;;  %702 = vmatpush.msrb.mxu3 %v500_v45  ;;  %v869_v44 = vld [vmem:[#allocation8 + $0x2e0] sm:$0xff]  ;;  %v806_v45 = vld [vmem:[#allocation8 + $0xe8] sm:$0xff] }
  0x93   :  { %634 = vmatpush.msrb.mxu0 %v431_v46  ;;  %657 = vmatpush.msrb.mxu1 %v495_v47  ;;  %v811_v46 = vld [vmem:[#allocation8 + $0x110] sm:$0xff] }
  0x94   :  { %680 = vmatpush.msrb.mxu2 %v432_v48  ;;  %703 = vmatpush.msrb.mxu3 %v496_v49  ;;  %v867_v48 = vld [vmem:[#allocation8 + $0x2d0] sm:$0xff]  ;;  %v804_v49 = vld [vmem:[#allocation8 + $0xd8] sm:$0xff] }
  0x95   :  { %635 = vmatpush.msrb.mxu0 %v427_v50  ;;  %658 = vmatpush.msrb.mxu1 %v491_v51  ;;  %v809_v50 = vld [vmem:[#allocation8 + $0x100] sm:$0xff] }
  0x96   :  { %681 = vmatpush.msrb.mxu2 %v428_v52  ;;  %704 = vmatpush.msrb.mxu3 %v492_v53  ;;  %v865_v51 = vld [vmem:[#allocation8 + $0x2c0] sm:$0xff]  ;;  %v903_v52 = vld [vmem:[#allocation8 + $0x3f0] sm:$0xff]  ;;  %v802_v53 = vld [vmem:[#allocation8 + $0xc8] sm:$0xff] }
  0x97   :  { %636 = vmatpush.msrb.mxu0 %v423_v54  ;;  %659 = vmatpush.msrb.mxu1 %v487_v55 }
  0x98   :  { %682 = vmatpush.msrb.mxu2 %v424_v56  ;;  %705 = vmatpush.msrb.mxu3 %v488_v57  ;;  %v840_v56 = vld [vmem:[#allocation8 + $0x1f8] sm:$0xff] }
  0x99   :  { %637 = vmatpush.msrb.mxu0 %v419_v58  ;;  %660 = vmatpush.msrb.mxu1 %v483_v59 }
  0x9a   :  { %683 = vmatpush.msrb.mxu2 %v420_v60  ;;  %706 = vmatpush.msrb.mxu3 %v484_v61  ;;  %v863_v60 = vld [vmem:[#allocation8 + $0x2b0] sm:$0xff]  ;;  %v901_v61 = vld [vmem:[#allocation8 + $0x3e0] sm:$0xff] }
  0x9b   :  { %638 = vmatpush.msrb.mxu0 %v415_v62  ;;  %661 = vmatpush.msrb.mxu1 %v479_v63  ;;  %v800_v62 = vld [vmem:[#allocation8 + $0xb8] sm:$0xff]  ;;  %v838_v63 = vld [vmem:[#allocation8 + $0x1e8] sm:$0xff] }
  0x9c   :  { %684 = vmatpush.msrb.mxu2 %v416_v0  ;;  %707 = vmatpush.msrb.mxu3 %v480_v1  ;;  %v861_v0 = vld [vmem:[#allocation8 + $0x2a0] sm:$0xff]  ;;  %v899_v1 = vld [vmem:[#allocation8 + $0x3d0] sm:$0xff] }
  0x9d   :  { %639 = vmatpush.msrb.mxu0 %v411_v2  ;;  %662 = vmatpush.msrb.mxu1 %v475_v3  ;;  %v798_v2 = vld [vmem:[#allocation8 + $0xa8] sm:$0xff] }
  0x9e   :  { %685 = vmatpush.msrb.mxu2 %v412_v4  ;;  %708 = vmatpush.msrb.mxu3 %v476_v5  ;;  %v836_v4 = vld [vmem:[#allocation8 + $0x1d8] sm:$0xff] }
  0x9f   :  { %640 = vmatpush.msrb.mxu0 %v407_v8  ;;  %663 = vmatpush.msrb.mxu1 %v471_v9  ;;  %v859_v8 = vld [vmem:[#allocation8 + $0x290] sm:$0xff]  ;;  %v897_v9 = vld [vmem:[#allocation8 + $0x3c0] sm:$0xff] }
  0xa0   :  { %686 = vmatpush.msrb.mxu2 %v408_v10  ;;  %709 = vmatpush.msrb.mxu3 %v472_v11  ;;  %v796_v10 = vld [vmem:[#allocation8 + $0x98] sm:$0xff]  ;;  %v834_v11 = vld [vmem:[#allocation8 + $0x1c8] sm:$0xff] }
  0xa1   :  { %641 = vmatmul.f32.vlgmr.msrb.gmra.mxu0 %v1340_v24  ;;  %664 = vmatmul.f32.vlgmr.msrb.gmra.mxu1 %v1342_v25 }
  0xa2   :  { %687 = vmatmul.f32.vlgmr.msrb.gmra.mxu2 %v1340_v24  ;;  %710 = vmatmul.f32.vlgmr.msrb.gmra.mxu3 %v1342_v25  ;;  %v799_v24 = vld [vmem:[#allocation8 + $0xb0] sm:$0xff] }
  0xa3   :  { %905 = vmatpush.msra.mxu0 %v807_v12  ;;  %928 = vmatpush.msra.mxu1 %v839_v16  ;;  %v835_v25 = vld [vmem:[#allocation8 + $0x1d0] sm:$0xff] }
  0xa4   :  { %951 = vmatpush.msra.mxu2 %v871_v41  ;;  %974 = vmatpush.msra.mxu3 %v903_v52  ;;  %v847_v41 = vld [vmem:[#allocation8 + $0x230] sm:$0xff] }
  0xa5   :  { %906 = vmatpush.msra.mxu0 %v805_v13  ;;  %929 = vmatpush.msra.mxu1 %v837_v17  ;;  %v857_v13 = vld [vmem:[#allocation8 + $0x280] sm:$0xff] }
  0xa6   :  { %952 = vmatpush.msra.mxu2 %v869_v44  ;;  %975 = vmatpush.msra.mxu3 %v901_v61  ;;  %v822_v44 = vld [vmem:[#allocation8 + $0x168] sm:$0xff]  ;;  %v879_v61 = vld [vmem:[#allocation8 + $0x330] sm:$0xff] }
  0xa7   :  { %907 = vmatpush.msra.mxu0 %v803_v14  ;;  %930 = vmatpush.msra.mxu1 %v835_v25  ;;  %v895_v14 = vld [vmem:[#allocation8 + $0x3b0] sm:$0xff] }
  0xa8   :  { %953 = vmatpush.msra.mxu2 %v867_v48  ;;  %976 = vmatpush.msra.mxu3 %v899_v1  ;;  %v816_v1 = vld [vmem:[#allocation8 + $0x138] sm:$0xff] }
  0xa9   :  { %644 = vmatmul.f32.gmra.mxu0 %v1348_v6  ;;  %667 = vmatmul.f32.gmra.mxu1 %v1350_v7 }
  0xaa   :  { %690 = vmatmul.f32.gmra.mxu2 %v1348_v6  ;;  %713 = vmatmul.f32.gmra.mxu3 %v1350_v7  ;;  %v795_v6 = vld [vmem:[#allocation8 + $0x90] sm:$0xff] }
  0xab   :  { %908 = vmatpush.msra.mxu0 %v801_v15  ;;  %v831_v7 = vld [vmem:[#allocation8 + $0x1b0] sm:$0xff]  ;;  %931 = vmatpush.msra.mxu1 %v833_v19  ;;  %v794_v15 = vld [vmem:[#allocation8 + $0x88] sm:$0xff]  ;;  %v893_v19 = vld [vmem:[#allocation8 + $0x3a0] sm:$0xff] }
  0xac   :  { %954 = vmatpush.msra.mxu2 %v865_v51  ;;  %977 = vmatpush.msra.mxu3 %v897_v9  ;;  %v820_v51 = vld [vmem:[#allocation8 + $0x158] sm:$0xff] }
  0xad   :  { %909 = vmatpush.msra.mxu0 %v799_v24  ;;  %932 = vmatpush.msra.mxu1 %v831_v7  ;;  %v832_v24 = vld [vmem:[#allocation8 + $0x1b8] sm:$0xff] }
  0xae   :  { %955 = vmatpush.msra.mxu2 %v863_v60  ;;  %978 = vmatpush.msra.mxu3 %v895_v14  ;;  %v841_v60 = vld [vmem:[#allocation8 + $0x200] sm:$0xff]  ;;  %v868_v14 = vld [vmem:[#allocation8 + $0x2d8] sm:$0xff] }
  0xaf   :  { %910 = vmatpush.msra.mxu0 %v797_v18  ;;  %933 = vmatpush.msra.mxu1 %v829_v22  ;;  %v855_v18 = vld [vmem:[#allocation8 + $0x270] sm:$0xff] }
  0xb0   :  { %956 = vmatpush.msra.mxu2 %v861_v0  ;;  %979 = vmatpush.msra.mxu3 %v893_v19  ;;  %v778_v0 = vld [vmem:[#allocation8 + $0x8] sm:$0xff] }
  0xb1   :  { %911 = vmatpush.msra.mxu0 %v795_v6  ;;  %934 = vmatpush.msra.mxu1 %v827_v26  ;;  %v792_v6 = vld [vmem:[#allocation8 + $0x78] sm:$0xff]  ;;  %v891_v26 = vld [vmem:[#allocation8 + $0x390] sm:$0xff] }
  0xb2   :  { %957 = vmatpush.msra.mxu2 %v859_v8  ;;  %980 = vmatpush.msra.mxu3 %v891_v26 }
  0xb3   :  { %912 = vmatpush.msra.mxu0 %v793_v20  ;;  %935 = vmatpush.msra.mxu1 %v825_v28 }
  0xb4   :  { %958 = vmatpush.msra.mxu2 %v857_v13  ;;  %v812_v13 = vld [vmem:[#allocation8 + $0x118] sm:$0xff] }
  0xb5   :  { %913 = vmatpush.msra.mxu0 %v791_v21  ;;  %936 = vmatpush.msra.mxu1 %v823_v30  ;;  %v830_v21 = vld [vmem:[#allocation8 + $0x1a8] sm:$0xff]  ;;  %v851_v30 = vld [vmem:[#allocation8 + $0x250] sm:$0xff] }
  0xb6   :  { %959 = vmatpush.msra.mxu2 %v855_v18 }
  0xb7   :  { %914 = vmatpush.msra.mxu0 %v789_v23  ;;  %937 = vmatpush.msra.mxu1 %v821_v32  ;;  %v853_v23 = vld [vmem:[#allocation8 + $0x260] sm:$0xff]  ;;  %v788_v32 = vld [vmem:[#allocation8 + $0x58] sm:$0xff] }
  0xb8   :  { %960 = vmatpush.msra.mxu2 %v853_v23  ;;  %v902_v23 = vld [vmem:[#allocation8 + $0x3e8] sm:$0xff] }
  0xb9   :  { %915 = vmatpush.msra.mxu0 %v787_v27  ;;  %938 = vmatpush.msra.mxu1 %v819_v34  ;;  %v790_v27 = vld [vmem:[#allocation8 + $0x68] sm:$0xff] }
  0xba   :  { %961 = vmatpush.msra.mxu2 %v851_v30  ;;  %v826_v34 = vld [vmem:[#allocation8 + $0x188] sm:$0xff] }
  0xbb   :  { %916 = vmatpush.msra.mxu0 %v785_v29  ;;  %939 = vmatpush.msra.mxu1 %v817_v36  ;;  %v828_v29 = vld [vmem:[#allocation8 + $0x198] sm:$0xff]  ;;  %v887_v36 = vld [vmem:[#allocation8 + $0x370] sm:$0xff] }
  0xbd   :  { %917 = vmatpush.msra.mxu0 %v783_v31  ;;  %940 = vmatpush.msra.mxu1 %v815_v40  ;;  %v889_v31 = vld [vmem:[#allocation8 + $0x380] sm:$0xff]  ;;  %v824_v40 = vld [vmem:[#allocation8 + $0x178] sm:$0xff] }
  0xbe   :  { %981 = vmatpush.msra.mxu3 %v889_v31 }
  0xbf   :  { %918 = vmatpush.msra.mxu0 %v781_v33  ;;  %941 = vmatpush.msra.mxu1 %v813_v43  ;;  %v784_v43 = vld [vmem:[#allocation8 + $0x38] sm:$0xff] }
  0xc0   :  { %982 = vmatpush.msra.mxu3 %v887_v36 }
  0xc1   :  { %919 = vmatpush.msra.mxu0 %v779_v35  ;;  %942 = vmatpush.msra.mxu1 %v811_v46  ;;  %v849_v35 = vld [vmem:[#allocation8 + $0x240] sm:$0xff]  ;;  %v883_v46 = vld [vmem:[#allocation8 + $0x350] sm:$0xff] }
  0xc2   :  { %962 = vmatpush.msra.mxu2 %v849_v35 }
  0xc3   :  { %v238_v37 = vpop.f32.mrf.mxu0  ;;  %v261_v38 = vpop.f32.mrf.mxu1  ;;  %920 = vmatpush.msra.mxu0 %v777_v39  ;;  %943 = vmatpush.msra.mxu1 %v809_v50  ;;  %v786_v39 = vld [vmem:[#allocation8 + $0x48] sm:$0xff] }
  0xc4   :  { %v1380_v47 = vadd.f32 %v261_v38, %v238_v37  ;;  %v284_v58 = vpop.f32.mrf.mxu2  ;;  %v307_v59 = vpop.f32.mrf.mxu3  ;;  %963 = vmatpush.msra.mxu2 %v847_v41  ;;  %v782_v50 = vld [vmem:[#allocation8 + $0x28] sm:$0xff] }
  0xc5   :  { %997 = vmatpush.msrb.mxu0 %v808_v42  ;;  %1020 = vmatpush.msrb.mxu1 %v840_v56  ;;  %v1383_v3 = vadd.f32 %v307_v59, %v284_v58  ;;  %v885_v42 = vld [vmem:[#allocation8 + $0x360] sm:$0xff]  ;;  %v780_v58 = vld [vmem:[#allocation8 + $0x18] sm:$0xff]  ;;  %v818_v59 = vld [vmem:[#allocation8 + $0x148] sm:$0xff] }
  0xc6   :  { %v717_v57 = vsub.f32 0.0, %v1380_v47  ;;  %983 = vmatpush.msra.mxu3 %v885_v42 }
  0xc7   :  { %998 = vmatpush.msrb.mxu0 %v806_v45  ;;  %1021 = vmatpush.msrb.mxu1 %v838_v63  ;;  %v718_v16 = vsub.f32 0.0, %v1383_v3  ;;  %v845_v45 = vld [vmem:[#allocation8 + $0x220] sm:$0xff] }
  0xc8   :  { %v725_v5 = vmul.f32 1.442695, %v717_v57  ;;  %964 = vmatpush.msra.mxu2 %v845_v45  ;;  %984 = vmatpush.msra.mxu3 %v883_v46 }
  0xc9   :  { %999 = vmatpush.msrb.mxu0 %v804_v49  ;;  %1022 = vmatpush.msrb.mxu1 %v836_v4  ;;  %v727_v28 = vmul.f32 1.442695, %v718_v16  ;;  %v877_v4 = vld [vmem:[#allocation8 + $0x320] sm:$0xff] }
  0xca   :  { %1128 = vpow2.f32 %v725_v5  ;;  %v814_v5 = vld [vmem:[#allocation8 + $0x128] sm:$0xff] }
  0xcb   :  { %1000 = vmatpush.msrb.mxu0 %v802_v53  ;;  %1023 = vmatpush.msrb.mxu1 %v834_v11  ;;  %1130 = vpow2.f32 %v727_v28  ;;  %v875_v11 = vld [vmem:[#allocation8 + $0x310] sm:$0xff]  ;;  %v864_v28 = vld [vmem:[#allocation8 + $0x2b8] sm:$0xff] }
  0xcd   :  { %1001 = vmatpush.msrb.mxu0 %v800_v62  ;;  %1024 = vmatpush.msrb.mxu1 %v832_v24 }
  0xcf   :  { %1002 = vmatpush.msrb.mxu0 %v798_v2  ;;  %1025 = vmatpush.msrb.mxu1 %v830_v21  ;;  %v872_v2 = vld [vmem:[#allocation8 + $0x2f8] sm:$0xff] }
  0xd0   :  { %v1129_v37 = vpop.eup %1128 }
  0xd1   :  { %1003 = vmatpush.msrb.mxu0 %v796_v10  ;;  %1026 = vmatpush.msrb.mxu1 %v828_v29  ;;  %v741_v48 = vadd.f32 1.0, %v1129_v37  ;;  %v1131_v62 = vpop.eup %1130  ;;  %v870_v10 = vld [vmem:[#allocation8 + $0x2e8] sm:$0xff] }
  0xd2   :  { %v742_v9 = vadd.f32 1.0, %v1131_v62  ;;  %v898_v37 = vld [vmem:[#allocation8 + $0x3c8] sm:$0xff] }
  0xd3   :  { %1004 = vmatpush.msrb.mxu0 %v794_v15  ;;  %1027 = vmatpush.msrb.mxu1 %v826_v34  ;;  %v873_v15 = vld [vmem:[#allocation8 + $0x300] sm:$0xff]  ;;  %v900_v34 = vld [vmem:[#allocation8 + $0x3d8] sm:$0xff] }
  0xd5   :  { %1005 = vmatpush.msrb.mxu0 %v792_v6  ;;  %1028 = vmatpush.msrb.mxu1 %v824_v40  ;;  %v866_v6 = vld [vmem:[#allocation8 + $0x2c8] sm:$0xff] }
  0xd7   :  { %1006 = vmatpush.msrb.mxu0 %v790_v27  ;;  %1029 = vmatpush.msrb.mxu1 %v822_v44 }
  0xd9   :  { %1007 = vmatpush.msrb.mxu0 %v788_v32  ;;  %1030 = vmatpush.msrb.mxu1 %v820_v51  ;;  %v862_v32 = vld [vmem:[#allocation8 + $0x2a8] sm:$0xff] }
  0xdb   :  { %v241_v54 = vpop.f32.mrf.mxu0  ;;  %v264_v55 = vpop.f32.mrf.mxu1  ;;  %1008 = vmatpush.msrb.mxu0 %v786_v39  ;;  %1031 = vmatpush.msrb.mxu1 %v818_v59 }
  0xdc   :  { %v1385_v12 = vadd.f32 %v264_v55, %v241_v54  ;;  %v287_v17 = vpop.f32.mrf.mxu2  ;;  %v310_v25 = vpop.f32.mrf.mxu3  ;;  %v843_v54 = vld [vmem:[#allocation8 + $0x210] sm:$0xff]  ;;  %v881_v55 = vld [vmem:[#allocation8 + $0x340] sm:$0xff] }
  0xdd   :  { %v1393_v33 = vadd.f32 %v310_v25, %v287_v17  ;;  %1009 = vmatpush.msrb.mxu0 %v784_v43  ;;  %965 = vmatpush.msra.mxu2 %v843_v54  ;;  %v810_v17 = vld [vmem:[#allocation8 + $0x108] sm:$0xff]  ;;  %v904_v25 = vld [vmem:[#allocation8 + $0x3f8] sm:$0xff] }
  0xde   :  { %v721_v22 = vsub.f32 0.0, %v1385_v12  ;;  %985 = vmatpush.msra.mxu3 %v881_v55  ;;  %1032 = vmatpush.msrb.mxu1 %v816_v1 }
  0xdf   :  { %v722_v49 = vsub.f32 0.0, %v1393_v33  ;;  %1010 = vmatpush.msrb.mxu0 %v782_v50  ;;  %966 = vmatpush.msra.mxu2 %v841_v60  ;;  %v894_v50 = vld [vmem:[#allocation8 + $0x3a8] sm:$0xff]  ;;  %v852_v60 = vld [vmem:[#allocation8 + $0x258] sm:$0xff] }
  0xe0   :  { %v733_v38 = vmul.f32 1.442695, %v721_v22  ;;  %986 = vmatpush.msra.mxu3 %v879_v61  ;;  %1033 = vmatpush.msrb.mxu1 %v814_v5  ;;  %v890_v61 = vld [vmem:[#allocation8 + $0x388] sm:$0xff] }
  0xe1   :  { %v735_v63 = vmul.f32 1.442695, %v722_v49  ;;  %1011 = vmatpush.msrb.mxu0 %v780_v58  ;;  %1043 = vmatpush.msrb.mxu2 %v872_v2  ;;  %v856_v49 = vld [vmem:[#allocation8 + $0x278] sm:$0xff] }
  0xe2   :  { %1132 = vpow2.f32 %v733_v38  ;;  %987 = vmatpush.msra.mxu3 %v877_v4  ;;  %1034 = vmatpush.msrb.mxu1 %v812_v13  ;;  %v846_v13 = vld [vmem:[#allocation8 + $0x228] sm:$0xff] }
  0xe3   :  { %1134 = vrcp.f32 %v741_v48  ;;  %1012 = vmatpush.msrb.mxu0 %v778_v0  ;;  %1044 = vmatpush.msrb.mxu2 %v870_v10 }
  0xe4   :  { %1136 = vpow2.f32 %v735_v63  ;;  %988 = vmatpush.msra.mxu3 %v875_v11  ;;  %1035 = vmatpush.msrb.mxu1 %v810_v17 }
  0xe5   :  { %v1388_v7 = vpop.f32.mrf.mxu0  ;;  %v1390_v20 = vpop.f32.mrf.mxu1  ;;  %1138 = vrcp.f32 %v742_v9  ;;  %1045 = vmatpush.msrb.mxu2 %v868_v14  ;;  %v886_v9 = vld [vmem:[#allocation8 + $0x368] sm:$0xff]  ;;  %v884_v14 = vld [vmem:[#allocation8 + $0x358] sm:$0xff] }
  0xe6   :  { %v1396_v52 = vpop.f32.mrf.mxu2  ;;  %v1398_v53 = vpop.f32.mrf.mxu3  ;;  %989 = vmatpush.msra.mxu3 %v873_v15  ;;  %v1411_v30 = vadd.f32 %v1390_v20, %v1388_v7  ;;  %v858_v7 = vld [vmem:[#allocation8 + $0x288] sm:$0xff]  ;;  %v896_v20 = vld [vmem:[#allocation8 + $0x3b8] sm:$0xff] }
  0xe7   :  { %1046 = vmatpush.msrb.mxu2 %v866_v6  ;;  %v1420_v44 = vadd.f32 %v1398_v53, %v1396_v52  ;;  %v854_v52 = vld [vmem:[#allocation8 + $0x268] sm:$0xff]  ;;  %v892_v53 = vld [vmem:[#allocation8 + $0x398] sm:$0xff] }
  0xe8   :  { %v1133_v8 = vpop.eup %1132  ;;  %1066 = vmatpush.msrb.mxu3 %v904_v25  ;;  %v719_v38 = vsub.f32 0.0, %v1411_v30  ;;  %v842_v25 = vld [vmem:[#allocation8 + $0x208] sm:$0xff] }
  0xe9   :  { %v1135_v16 = vpop.eup %1134  ;;  %v745_v24 = vadd.f32 1.0, %v1133_v8  ;;  %1047 = vmatpush.msrb.mxu2 %v864_v28  ;;  %v720_v59 = vsub.f32 0.0, %v1420_v44  ;;  %v848_v8 = vld [vmem:[#allocation8 + $0x238] sm:$0xff] }
  0xea   :  { %v757_v26 = vmul.f32 %v1135_v16, %v1380_v47  ;;  %v1137_v29 = vpop.eup %1136  ;;  %1067 = vmatpush.msrb.mxu3 %v902_v23  ;;  %v860_v47 = vld [vmem:[#allocation8 + $0x298] sm:$0xff]  ;;  %v729_v54 = vmul.f32 1.442695, %v719_v38  ;;  %v874_v23 = vld [vmem:[#allocation8 + $0x308] sm:$0xff] }
  0xeb   :  { %1140 = vrcp.f32 %v745_v24  ;;  %v1139_v35 = vpop.eup %1138  ;;  %v746_v36 = vadd.f32 1.0, %v1137_v29  ;;  %1048 = vmatpush.msrb.mxu2 %v862_v32  ;;  %v731_v2 = vmul.f32 1.442695, %v720_v59  ;;  %v844_v16 = vld [vmem:[#allocation8 + $0x218] sm:$0xff]  ;;  %v882_v24 = vld [vmem:[#allocation8 + $0x348] sm:$0xff] }
  0xec   :  { %1068 = vmatpush.msrb.mxu3 %v900_v34  ;;  %v758_v42 = vmul.f32 %v1139_v35, %v1383_v3 }
  0xed   :  { %1049 = vmatpush.msrb.mxu2 %v860_v47  ;;  %1142 = vrcp.f32 %v746_v36 }
  0xee   :  { %1069 = vmatpush.msrb.mxu3 %v898_v37  ;;  %1144 = vpow2.f32 %v729_v54 }
  0xef   :  { %v1400_v56 = vpop.f32.mrf.mxu0  ;;  %v1402_v57 = vpop.f32.mrf.mxu1  ;;  %1050 = vmatpush.msrb.mxu2 %v858_v7  ;;  %1146 = vpow2.f32 %v731_v2 }
  0xf0   :  { %v1404_v18 = vpop.f32.mrf.mxu2  ;;  %v1406_v19 = vpop.f32.mrf.mxu3  ;;  %1070 = vmatpush.msrb.mxu3 %v896_v20  ;;  %v1427_v3 = vadd.f32 %v1402_v57, %v1400_v56  ;;  %v850_v56 = vld [vmem:[#allocation8 + $0x248] sm:$0xff]  ;;  %v888_v57 = vld [vmem:[#allocation8 + $0x378] sm:$0xff] }
  0xf1   :  { %v1141_v41 = vpop.eup %1140  ;;  %1051 = vmatpush.msrb.mxu2 %v856_v49  ;;  %v1435_v4 = vadd.f32 %v1406_v19, %v1404_v18  ;;  %v880_v18 = vld [vmem:[#allocation8 + $0x338] sm:$0xff]  ;;  %v878_v19 = vld [vmem:[#allocation8 + $0x328] sm:$0xff] }
  0xf2   :  { %v761_v51 = vmul.f32 %v1141_v41, %v1385_v12  ;;  %1071 = vmatpush.msrb.mxu3 %v894_v50  ;;  %v723_v62 = vsub.f32 0.0, %v1427_v3 }
  0xf3   :  { %1052 = vmatpush.msrb.mxu2 %v854_v52  ;;  %v1143_v12 = vpop.eup %1142 }
  0xf4   :  { %1072 = vmatpush.msrb.mxu3 %v892_v53  ;;  %v762_v1 = vmul.f32 %v1143_v12, %v1393_v33  ;;  %v737_v10 = vmul.f32 1.442695, %v723_v62  ;;  %v1145_v15 = vpop.eup %1144  ;;  %v724_v33 = vsub.f32 0.0, %v1435_v4 }
  0xf5   :  { %1053 = vmatpush.msrb.mxu2 %v852_v60  ;;  %v743_v17 = vadd.f32 1.0, %v1145_v15 }
  0xf6   :  { %1073 = vmatpush.msrb.mxu3 %v890_v61  ;;  %1148 = vpow2.f32 %v737_v10  ;;  %v739_v6 = vmul.f32 1.442695, %v724_v33 }
  0xf7   :  { %1054 = vmatpush.msrb.mxu2 %v850_v56  ;;  %1150 = vrcp.f32 %v743_v17 }
  0xf8   :  { %1074 = vmatpush.msrb.mxu3 %v888_v57  ;;  %1152 = vpow2.f32 %v739_v6 }
  0xf9   :  { %1055 = vmatpush.msrb.mxu2 %v848_v8 }
  0xfa   :  { %v550_v21 = vpop.f32.mrf.mxu0  ;;  %v573_v22 = vpop.f32.mrf.mxu1  ;;  %1075 = vmatpush.msrb.mxu3 %v886_v9 }
  0xfb   :  { %v574_v27 = vadd.f32 %v573_v22, %v550_v21  ;;  %1056 = vmatpush.msrb.mxu2 %v846_v13  ;;  %v876_v21 = vld [vmem:[#allocation8 + $0x318] sm:$0xff]  ;;  %v1147_v22 = vpop.eup %1146 }
  0xfc   :  { %1076 = vmatpush.msrb.mxu3 %v884_v14 }
  0xfd   :  { %v1413_v31 = vmul.f32 %v757_v26, %v574_v27  ;;  %1057 = vmatpush.msrb.mxu2 %v844_v16  ;;  %v1149_v26 = vpop.eup %1148  ;;  %v744_v27 = vadd.f32 1.0, %v1147_v22 }
  0xfe   :  { %1077 = vmatpush.msrb.mxu3 %v882_v24  ;;  %v747_v28 = vadd.f32 1.0, %v1149_v26  ;;  %v1151_v29 = vpop.eup %1150 }
  0xff   :  { %921 = vmatmul.f32.vlgmr.msra.gmra.mxu0 %v1413_v31  ;;  %1058 = vmatpush.msrb.mxu2 %v842_v25  ;;  %1154 = vrcp.f32 %v744_v27  ;;  %v759_v35 = vmul.f32 %v1151_v29, %v1411_v30 }
 0x100   :  { %1078 = vmatpush.msrb.mxu3 %v880_v18  ;;  %1156 = vrcp.f32 %v747_v28 }
 0x101   :  { %v596_v39 = vpop.f32.mrf.mxu2  ;;  %v619_v40 = vpop.f32.mrf.mxu3 }
 0x102   :  { %v620_v43 = vadd.f32 %v619_v40, %v596_v39  ;;  %1079 = vmatpush.msrb.mxu3 %v878_v19 }
 0x104   :  { %v1422_v45 = vmul.f32 %v758_v42, %v620_v43  ;;  %v553_v46 = vpop.f32.mrf.mxu0  ;;  %v576_v48 = vpop.f32.mrf.mxu1  ;;  %1080 = vmatpush.msrb.mxu3 %v876_v21 }
 0x105   :  { %v577_v55 = vadd.f32 %v576_v48, %v553_v46 }
 0x106   :  { %944 = vmatmul.f32.vlgmr.msra.gmra.mxu1 %v1422_v45  ;;  %1081 = vmatpush.msrb.mxu3 %v874_v23 }
 0x107   :  { %v769_v58 = vmul.f32 %v761_v51, %v577_v55 }
 0x109   :  { %924 = vmatmul.f32.gmra.mxu0 %v769_v58 }
 0x10b   :  { %v599_v63 = vpop.f32.mrf.mxu2  ;;  %v622_v0 = vpop.f32.mrf.mxu3 }
 0x10c   :  { %v623_v5 = vadd.f32 %v622_v0, %v599_v63 }
 0x10e   :  { %v770_v11 = vmul.f32 %v762_v1, %v623_v5 }
 0x110   :  { %947 = vmatmul.f32.gmra.mxu1 %v770_v11 }
 0x111   :  { %1013 = vmatmul.f32.vlgmr.msrb.gmra.mxu0 %v1413_v31  ;;  %v1153_v31 = vpop.eup %1152 }
 0x112   :  { %v748_v47 = vadd.f32 1.0, %v1153_v31  ;;  %v1155_v38 = vpop.eup %1154 }
 0x113   :  { %v1157_v39 = vpop.eup %1156  ;;  %v760_v20 = vmul.f32 %v1155_v38, %v1420_v44 }
 0x114   :  { %1158 = vrcp.f32 %v748_v47 }
 0x118   :  { %1036 = vmatmul.f32.vlgmr.msrb.gmra.mxu1 %v1422_v45  ;;  %v763_v45 = vmul.f32 %v1157_v39, %v1427_v3 }
 0x119   :  { %1016 = vmatmul.f32.gmra.mxu0 %v769_v58 }
 0x11a   :  { %v1159_v49 = vpop.eup %1158 }
 0x11b   :  { %v764_v54 = vmul.f32 %v1159_v49, %v1435_v4 }
 0x11e   :  { %v642_v32 = vpop.f32.mrf.mxu0  ;;  %v665_v34 = vpop.f32.mrf.mxu1 }
 0x11f   :  { %v666_v36 = vadd.f32 %v665_v34, %v642_v32 }
 0x120   :  { %1039 = vmatmul.f32.gmra.mxu1 %v770_v11 }
 0x121   :  { %v767_v37 = vmul.f32 %v759_v35, %v666_v36 }
 0x123   :  { %967 = vmatmul.f32.vlgmr.msra.gmra.mxu2 %v767_v37 }
 0x125   :  { %v688_v40 = vpop.f32.mrf.mxu2  ;;  %v711_v7 = vpop.f32.mrf.mxu3 }
 0x126   :  { %v712_v41 = vadd.f32 %v711_v7, %v688_v40  ;;  %v645_v42 = vpop.f32.mrf.mxu0  ;;  %v668_v43 = vpop.f32.mrf.mxu1 }
 0x127   :  { %v669_v46 = vadd.f32 %v668_v43, %v645_v42 }
 0x128   :  { %v768_v48 = vmul.f32 %v760_v20, %v712_v41 }
 0x129   :  { %v771_v30 = vmul.f32 %v763_v45, %v669_v46 }
 0x12a   :  { %990 = vmatmul.f32.vlgmr.msra.gmra.mxu3 %v768_v48 }
 0x12b   :  { %970 = vmatmul.f32.gmra.mxu2 %v771_v30 }
 0x12d   :  { %v691_v50 = vpop.f32.mrf.mxu2  ;;  %v714_v51 = vpop.f32.mrf.mxu3 }
 0x12e   :  { %v715_v55 = vadd.f32 %v714_v51, %v691_v50 }
 0x130   :  { %v772_v52 = vmul.f32 %v764_v54, %v715_v55 }
 0x132   :  { %993 = vmatmul.f32.gmra.mxu3 %v772_v52 }
 0x133   :  { %1059 = vmatmul.f32.vlgmr.msrb.gmra.mxu2 %v767_v37 }
 0x13a   :  { %1082 = vmatmul.f32.vlgmr.msrb.gmra.mxu3 %v768_v48 }
 0x13b   :  { %1062 = vmatmul.f32.gmra.mxu2 %v771_v30 }
 0x142   :  { %1085 = vmatmul.f32.gmra.mxu3 %v772_v52 }
 0x17c   :  { %v922_v53 = vpop.f32.mrf.mxu0 }
 0x183   :  { %v945_v44 = vpop.f32.mrf.mxu1 }
 0x184   :  { %v946_v58 = vadd.f32 %v945_v44, %v922_v53 }
 0x186   :  { %v925_v61 = vpop.f32.mrf.mxu0 }
 0x18d   :  { %v948_v59 = vpop.f32.mrf.mxu1 }
 0x18e   :  { %v949_v57 = vadd.f32 %v948_v59, %v925_v61  ;;  %v1014_v4 = vpop.f32.mrf.mxu0 }
 0x195   :  { %v1037_v0 = vpop.f32.mrf.mxu1 }
 0x196   :  { %v1038_v8 = vadd.f32 %v1037_v0, %v1014_v4  ;;  %v1017_v14 = vpop.f32.mrf.mxu0 }
 0x19d   :  { %v1040_v13 = vpop.f32.mrf.mxu1 }
 0x19e   :  { %v1041_v16 = vadd.f32 %v1040_v13, %v1017_v14 }
 0x1a6   :  { %v968_v3 = vpop.f32.mrf.mxu2 }
 0x1a7   :  { %v969_v60 = vadd.f32 %v968_v3, %v946_v58 }
 0x1ad   :  { %v991_v12 = vpop.f32.mrf.mxu3 }
 0x1ae   :  { %v992_v62 = vadd.f32 %v991_v12, %v969_v60  ;;  %v971_v56 = vpop.f32.mrf.mxu2 }
 0x1af   :  { %v972_v63 = vadd.f32 %v971_v56, %v949_v57 }
 0x1b0   :  { %1093 = vst [vmem:[#allocation10] sm:$0xff] %v992_v62 }
 0x1b5   :  { %v994_v1 = vpop.f32.mrf.mxu3 }
 0x1b6   :  { %v995_v2 = vadd.f32 %v994_v1, %v972_v63  ;;  %v1060_v5 = vpop.f32.mrf.mxu2 }
 0x1b7   :  { %v1061_v9 = vadd.f32 %v1060_v5, %v1038_v8 }
 0x1b8   :  { %1095 = vst [vmem:[#allocation10 + $0x10] sm:$0xff] %v995_v2 }
 0x1bd   :  { %v1083_v10 = vpop.f32.mrf.mxu3 }
 0x1be   :  { %v1084_v11 = vadd.f32 %v1083_v10, %v1061_v9  ;;  %v1063_v15 = vpop.f32.mrf.mxu2 }
 0x1bf   :  { %v1064_v24 = vadd.f32 %v1063_v15, %v1041_v16 }
 0x1c0   :  { %1094 = vst [vmem:[#allocation10 + $0x8] sm:$0xff] %v1084_v11 }
 0x1c5   :  { %v1086_v33 = vpop.f32.mrf.mxu3 }
 0x1c6   :  { %v1087_v17 = vadd.f32 %v1086_v33, %v1064_v24 }
 0x1c8   :  { %1096 = vst [vmem:[#allocation10 + $0x18] sm:$0xff] %v1087_v17 }
 0x1c9   :  { %1109 = dma.vmem_to_hbm [thread:$0]  %s1102_s3, 512, %s1104_s13, [#allocation4], %s1292_s27, %s1292_s27, %s1293_s28  }
 0x1ca   :  { %1286 = dma.done.wait [#allocation4], 512  }
 0x1cb   :  { %1287 = vsyncadd [#allocation4], 4294966784 }
 0x1cc   :  { %1114 = vsyncpa [#allocation3], 1 }
 0x1cd   :  { %1115 = vsyncpa [#allocation6], 1 }
 0x1ce   :  { %1116 = vsyncpa [#allocation9], 1 }
 0x1cf   :  { %1117 = vsyncpa [#allocation4], 1 }

</bundles_post_ra>
